<compile_context>
chip_gen: v6e
topology: v6e:2x2x1
jax: 0.10.0
libtpu: 0.0.40
codegen_flags: <defaults>
</compile_context>

<pallas_src>
import functools

import jax
import jax.numpy as jnp
from jax.experimental import pallas as pl
from jax.experimental.pallas import tpu as pltpu


def rnn_sender_kernel(x_ref, wa_ref, ba_ref, b_first_ref, b_cell_ref,
                      w_rec_ref, wout_ref, bout_ref,
                      seq_ref, logp_ref, ent_ref, rec_ref, *, steps):
    TB = x_ref.shape[0]
    H = wout_ref.shape[0]
    V = wout_ref.shape[1]
    bf = jnp.bfloat16

    # Hoist all weight / bias reads out of the unrolled step loop.  Weights are already
    # bf16 (pre-cast in the wrapper); biases stay f32 and broadcast over sublanes on use.
    wa = wa_ref[...]            # (F, H)   bf16
    w_rec = w_rec_ref[...]      # (V+H, H) bf16 = [emb @ W_ih ; W_hh]
    wout = wout_ref[...]        # (H, V)   bf16
    ba = ba_ref[...]            # (1, H)   f32
    b_first = b_first_ref[...]  # (1, H)   f32 = b_ih + b_hh + sos @ W_ih   (step 0)
    b_cell = b_cell_ref[...]    # (1, H)   f32 = b_ih + b_hh                (steps > 0)
    b_out = bout_ref[...]       # (1, V)   f32

    # agent(x): wrapped agent modeled as one linear layer -> initial hidden state.
    h_bf = (jnp.dot(x_ref[...], wa, preferred_element_type=jnp.float32) + ba).astype(bf)

    lane_idx = jax.lax.broadcasted_iota(jnp.int32, (TB, V), 1)

    # Fused recurrence operand: lanes [0,V) hold one-hot(previous token), lanes [V,V+H)
    # hold the bf16 hidden state, so x@W_ih + h@W_hh is a single MXU issue per step.
    # Step 0 has no previous token (sos@W_ih rides in b_first), so zero the one-hot part.
    rec_ref[:, :V] = jnp.zeros((TB, V), bf)

    # TODO(synk): replace this full unroll with lax.fori_loop(unroll=4) for large max_len.
    for t in range(steps):
        # nn.RNNCell: h' = tanh(x @ W_ih + b_ih + h @ W_hh + b_hh); Noise layer = identity.
        rec_ref[:, V:V + H] = h_bf
        pre = jnp.dot(rec_ref[...], w_rec, preferred_element_type=jnp.float32)
        h_bf = jnp.tanh(pre + (b_first if t == 0 else b_cell)).astype(bf)

        # hidden_to_output; softmax statistics computed once and reused for everything.
        o = jnp.dot(h_bf, wout, preferred_element_type=jnp.float32) + b_out
        m = jnp.max(o, axis=-1, keepdims=True)
        z = o - m
        ez = jnp.exp(z)
        s = jnp.sum(ez, axis=-1, keepdims=True)
        lse = jnp.log(s)

        # eval mode: token = argmax (first max index, like torch.argmax), from o == max(o).
        tok = jnp.min(jnp.where(o == m, lane_idx, V), axis=-1, keepdims=True)  # (TB,1) i32

        # Columns go straight into the VMEM-resident output block (one HBM writeback per
        # grid step).  log_prob(argmax) == -logsumexp(z);
        # Categorical entropy = lse - sum(exp(z)*z)/sum(exp(z))  (reuses ez).
        seq_ref[:, t:t + 1] = tok
        logp_ref[:, t:t + 1] = -lse
        ent_ref[:, t:t + 1] = lse - jnp.sum(ez * z, axis=-1, keepdims=True) / s

        if t + 1 < steps:
            # next step's token one-hot (its emb@W_ih contribution rides inside W_rec).
            rec_ref[:, :V] = (lane_idx == tok).astype(bf)

    # force_eos: last column is zeros.
    seq_ref[:, steps:steps + 1] = jnp.zeros((TB, 1), jnp.int32)
    logp_ref[:, steps:steps + 1] = jnp.zeros((TB, 1), jnp.float32)
    ent_ref[:, steps:steps + 1] = jnp.zeros((TB, 1), jnp.float32)


def _fuse_params(params, mxu_dtype=jnp.bfloat16):
    """Pre-fuse / pre-cast parameters once, outside the kernel.

    Returns (Wa, ba, b_first, b_cell, W_rec, W_out, b_out) where
      W_rec   = [emb @ W_ih ; W_hh]        (V+H, H) in MXU dtype (bf16)
      b_first = b_ih + b_hh + sos @ W_ih   (1, H) f32   step-0 bias (folds the sos input)
      b_cell  = b_ih + b_hh                (1, H) f32
    NOTE: fusing the biases changes the f32 summation order vs PyTorch's
    (x@Wih + b_ih) + (h@Whh + b_hh); the in-repo reference mirrors it exactly.
    """
    wa, ba, sos, wih, bih, whh, bhh, wout, bout, emb = params
    emb_wih = jnp.dot(emb, wih)                       # (V, H) embedding folded into W_ih
    w_rec = jnp.concatenate([emb_wih, whh], axis=0)   # (V+H, H) fused recurrence weight
    b_cell = bih + bhh
    b_first = b_cell + jnp.dot(sos, wih)
    return (wa.astype(mxu_dtype), ba, b_first, b_cell,
            w_rec.astype(mxu_dtype), wout.astype(mxu_dtype), bout)


def rnn_sender_forward(x, params, max_len, *, num_batch_blocks=1):
    """params = (Wa, ba, sos, Wih, bih, Whh, bhh, Wout, bout, emb).

    num_batch_blocks: grid size along the (parallel) batch axis.  1 (whole batch per
    block) is best on v5e/v6e (one TensorCore); use 2 on v7x so megacore shards the
    serial decode across both TensorCores.
    """
    assert max_len > 1, "force_eos requires max_len > 1"
    steps = max_len - 1                                   # force_eos=True
    wa, ba, b_first, b_cell, w_rec, wout, bout = _fuse_params(params)
    B, F = x.shape
    VH = w_rec.shape[0]                                   # V + H

    nb = num_batch_blocks
    assert B % nb == 0, "batch must divide num_batch_blocks"
    tb = B // nb
    assert tb == B or tb % 8 == 0, "batch tile must be the full batch or a multiple of 8"

    x_bf = x.astype(jnp.bfloat16)                         # MXU operand; halves x DMA bytes

    kernel = functools.partial(rnn_sender_kernel, steps=steps)
    rep = lambda a: pl.BlockSpec(a.shape, lambda i: (0, 0))       # replicated weights
    batched = lambda cols: pl.BlockSpec((tb, cols), lambda i: (i, 0))

    out_shapes = (jax.ShapeDtypeStruct((B, max_len), jnp.int32),
                  jax.ShapeDtypeStruct((B, max_len), jnp.float32),
                  jax.ShapeDtypeStruct((B, max_len), jnp.float32))

    return pl.pallas_call(
        kernel,
        out_shape=out_shapes,
        grid=(nb,),
        in_specs=[batched(F),
                  rep(wa), rep(ba), rep(b_first), rep(b_cell),
                  rep(w_rec), rep(wout), rep(bout)],
        out_specs=(batched(max_len), batched(max_len), batched(max_len)),
        scratch_shapes=[pltpu.VMEM((tb, VH), jnp.bfloat16)],      # fused recurrence input
        compiler_params=pltpu.CompilerParams(
            dimension_semantics=("parallel",)),
    )(x_bf, wa, ba, b_first, b_cell, w_rec, wout, bout)


def rnn_sender_reference(x, params, max_len):
    """Pure-JAX reference mirroring the PyTorch forward (eval mode).

    Uses the same bf16 MXU operands / fused W_rec & biases as the kernel so tokens track
    the kernel exactly; log_prob/entropy are computed the textbook way.
    """
    wa, ba, b_first, b_cell, w_rec, wout, bout = _fuse_params(params)
    B = x.shape[0]
    V = wout.shape[1]
    bf = jnp.bfloat16
    mm = lambda a, b: jnp.dot(a, b, preferred_element_type=jnp.float32)

    h_bf = (mm(x.astype(bf), wa) + ba).astype(bf)
    onehot = jnp.zeros((B, V), bf)

    seqs, lps, ents = [], [], []
    for t in range(max_len - 1):
        pre = mm(jnp.concatenate([onehot, h_bf], axis=-1), w_rec)
        h_bf = jnp.tanh(pre + (b_first if t == 0 else b_cell)).astype(bf)
        o = mm(h_bf, wout) + bout
        logp = jax.nn.log_softmax(o, axis=1)
        tok = jnp.argmax(o, axis=1)
        seqs.append(tok.astype(jnp.int32))
        lps.append(jnp.take_along_axis(logp, tok[:, None], axis=1)[:, 0])
        ents.append(-jnp.sum(jnp.exp(logp) * logp, axis=1))
        onehot = jax.nn.one_hot(tok, V, dtype=bf)

    seq = jnp.stack(seqs, axis=1)
    lp = jnp.stack(lps, axis=1)
    en = jnp.stack(ents, axis=1)
    zi = jnp.zeros((B, 1), jnp.int32)
    zf = jnp.zeros((B, 1), jnp.float32)
    return (jnp.concatenate([seq, zi], axis=1),
            jnp.concatenate([lp, zf], axis=1),
            jnp.concatenate([en, zf], axis=1))


if __name__ == "__main__":
    B, F, E, H, V, MAX_LEN = 16, 16, 32, 32, 16, 8

    key = jax.random.PRNGKey(0)
    ks = jax.random.split(key, 12)
    x = jax.random.normal(ks[0], (B, F), jnp.float32)

    # deterministic synthetic parameters (agent linear, RNNCell, output head, embedding)
    wa = 0.1 * jax.random.normal(ks[1], (F, H), jnp.float32)
    ba = 0.1 * jax.random.normal(ks[2], (1, H), jnp.float32)
    sos = 0.01 * jax.random.normal(ks[3], (1, E), jnp.float32)   # sos_embedding ~ N(0, 0.01)
    wih = 0.1 * jax.random.normal(ks[4], (E, H), jnp.float32)
    bih = 0.1 * jax.random.normal(ks[5], (1, H), jnp.float32)
    whh = 0.1 * jax.random.normal(ks[6], (H, H), jnp.float32)
    bhh = 0.1 * jax.random.normal(ks[7], (1, H), jnp.float32)
    wout = 0.1 * jax.random.normal(ks[8], (H, V), jnp.float32)
    bout = 0.1 * jax.random.normal(ks[9], (1, V), jnp.float32)
    emb = 0.1 * jax.random.normal(ks[10], (V, E), jnp.float32)

    params = (wa, ba, sos, wih, bih, whh, bhh, wout, bout, emb)

    seq, log_prob, entropy = jax.block_until_ready(rnn_sender_forward(x, params, MAX_LEN))
    seq_r, log_prob_r, entropy_r = rnn_sender_reference(x, params, MAX_LEN)

    assert seq.shape == (B, MAX_LEN) and log_prob.shape == (B, MAX_LEN) and entropy.shape == (B, MAX_LEN)
    # exact token match (bf16 matmuls / fused weights are mirrored in the reference);
    # looser allclose for the transcendental chains (tanh/exp/log may differ Mosaic vs XLA).
    assert jnp.array_equal(seq, seq_r), "sequence mismatch"
    assert jnp.allclose(log_prob, log_prob_r, atol=1e-3, rtol=1e-4), "log_prob mismatch"
    assert jnp.allclose(entropy, entropy_r, atol=1e-3, rtol=1e-4), "entropy mismatch"

    print("KERNEL_OK")
</pallas_src>

<mosaic_0001>
module attributes {stable_mosaic.version = 11 : i64} {
  func.func @rnn_sender_kernel(%arg0: i32, %arg1: memref<16x16xbf16, #tpu.memory_space<vmem>>, %arg2: memref<16x32xbf16, #tpu.memory_space<vmem>>, %arg3: memref<1x32xf32, #tpu.memory_space<vmem>>, %arg4: memref<1x32xf32, #tpu.memory_space<vmem>>, %arg5: memref<1x32xf32, #tpu.memory_space<vmem>>, %arg6: memref<48x32xbf16, #tpu.memory_space<vmem>>, %arg7: memref<32x16xbf16, #tpu.memory_space<vmem>>, %arg8: memref<1x16xf32, #tpu.memory_space<vmem>>, %arg9: memref<16x8xi32, #tpu.memory_space<vmem>>, %arg10: memref<16x8xf32, #tpu.memory_space<vmem>>, %arg11: memref<16x8xf32, #tpu.memory_space<vmem>>, %arg12: memref<16x48xbf16, #tpu.memory_space<vmem>>) attributes {dimension_semantics = [#tpu.dimension_semantics<parallel>], iteration_bounds = array<i64: 1>, scalar_prefetch = 0 : i64, scratch_operands = 1 : i64, tpu.core_type = #tpu.core_type<tc>, window_params = [{transform_indices = @transform_0, window_bounds = array<i64: 16, 16>}, {pipeline_mode = #tpu.pipeline_mode<synchronous>, transform_indices = @transform_1, window_bounds = array<i64: 16, 32>}, {pipeline_mode = #tpu.pipeline_mode<synchronous>, transform_indices = @transform_2, window_bounds = array<i64: 1, 32>}, {pipeline_mode = #tpu.pipeline_mode<synchronous>, transform_indices = @transform_3, window_bounds = array<i64: 1, 32>}, {pipeline_mode = #tpu.pipeline_mode<synchronous>, transform_indices = @transform_4, window_bounds = array<i64: 1, 32>}, {pipeline_mode = #tpu.pipeline_mode<synchronous>, transform_indices = @transform_5, window_bounds = array<i64: 48, 32>}, {pipeline_mode = #tpu.pipeline_mode<synchronous>, transform_indices = @transform_6, window_bounds = array<i64: 32, 16>}, {pipeline_mode = #tpu.pipeline_mode<synchronous>, transform_indices = @transform_7, window_bounds = array<i64: 1, 16>}, {transform_indices = @transform_8, window_bounds = array<i64: 16, 8>}, {transform_indices = @transform_9, window_bounds = array<i64: 16, 8>}, {transform_indices = @transform_10, window_bounds = array<i64: 16, 8>}]} {
    %c0 = arith.constant 0 : index
    %c0_0 = arith.constant 0 : index
    %0 = vector.load %arg2[%c0, %c0_0] : memref<16x32xbf16, #tpu.memory_space<vmem>>, vector<16x32xbf16>
    %c0_1 = arith.constant 0 : index
    %c0_2 = arith.constant 0 : index
    %1 = vector.load %arg6[%c0_1, %c0_2] : memref<48x32xbf16, #tpu.memory_space<vmem>>, vector<48x32xbf16>
    %c0_3 = arith.constant 0 : index
    %c0_4 = arith.constant 0 : index
    %2 = vector.load %arg7[%c0_3, %c0_4] : memref<32x16xbf16, #tpu.memory_space<vmem>>, vector<32x16xbf16>
    %c0_5 = arith.constant 0 : index
    %c0_6 = arith.constant 0 : index
    %3 = vector.load %arg3[%c0_5, %c0_6] : memref<1x32xf32, #tpu.memory_space<vmem>>, vector<1x32xf32>
    %c0_7 = arith.constant 0 : index
    %c0_8 = arith.constant 0 : index
    %4 = vector.load %arg4[%c0_7, %c0_8] : memref<1x32xf32, #tpu.memory_space<vmem>>, vector<1x32xf32>
    %c0_9 = arith.constant 0 : index
    %c0_10 = arith.constant 0 : index
    %5 = vector.load %arg5[%c0_9, %c0_10] : memref<1x32xf32, #tpu.memory_space<vmem>>, vector<1x32xf32>
    %c0_11 = arith.constant 0 : index
    %c0_12 = arith.constant 0 : index
    %6 = vector.load %arg8[%c0_11, %c0_12] : memref<1x16xf32, #tpu.memory_space<vmem>>, vector<1x16xf32>
    %c0_13 = arith.constant 0 : index
    %c0_14 = arith.constant 0 : index
    %7 = vector.load %arg1[%c0_13, %c0_14] : memref<16x16xbf16, #tpu.memory_space<vmem>>, vector<16x16xbf16>
    %cst = arith.constant dense<0.000000e+00> : vector<16x32xf32>
    %8 = tpu.matmul %7, %0, %cst {dimension_numbers = #tpu.dot_dimension_numbers<[1], [0], [0], [1], [0, 0, 1, 1], [], []>} : vector<16x16xbf16>, vector<16x32xbf16>, vector<16x32xf32> -> vector<16x32xf32>
    %9 = vector.broadcast %3 : vector<1x32xf32> to vector<16x32xf32>
    %10 = arith.addf %8, %9 : vector<16x32xf32>
    %11 = arith.truncf %10 : vector<16x32xf32> to vector<16x32xbf16>
    %12 = tpu.iota {dimensions = array<i32: 1>} : vector<16x16xi32>
    %cst_15 = arith.constant 0.000000e+00 : bf16
    %13 = vector.broadcast %cst_15 : bf16 to vector<16x16xbf16>
    %c0_16 = arith.constant 0 : index
    %c0_17 = arith.constant 0 : index
    %14 = vector.load %arg12[%c0_16, %c0_17] : memref<16x48xbf16, #tpu.memory_space<vmem>>, vector<16x16xbf16>
    tpu.vector_store %arg12[%c0_16, %c0_17], %13 {strides = array<i32>} : memref<16x48xbf16, #tpu.memory_space<vmem>>, vector<16x16xbf16>,
    %c0_18 = arith.constant 0 : index
    %c16 = arith.constant 16 : index
    %15 = vector.load %arg12[%c0_18, %c16] : memref<16x48xbf16, #tpu.memory_space<vmem>>, vector<16x32xbf16>
    tpu.vector_store %arg12[%c0_18, %c16], %11 {strides = array<i32>} : memref<16x48xbf16, #tpu.memory_space<vmem>>, vector<16x32xbf16>,
    %c0_19 = arith.constant 0 : index
    %c0_20 = arith.constant 0 : index
    %16 = vector.load %arg12[%c0_19, %c0_20] : memref<16x48xbf16, #tpu.memory_space<vmem>>, vector<16x48xbf16>
    %cst_21 = arith.constant dense<0.000000e+00> : vector<16x32xf32>
    %17 = tpu.matmul %16, %1, %cst_21 {dimension_numbers = #tpu.dot_dimension_numbers<[1], [0], [0], [1], [0, 0, 1, 1], [], []>} : vector<16x48xbf16>, vector<48x32xbf16>, vector<16x32xf32> -> vector<16x32xf32>
    %18 = vector.broadcast %4 : vector<1x32xf32> to vector<16x32xf32>
    %19 = arith.addf %17, %18 : vector<16x32xf32>
    %20 = math.tanh %19 : vector<16x32xf32>
    %21 = arith.truncf %20 : vector<16x32xf32> to vector<16x32xbf16>
    %cst_22 = arith.constant dense<0.000000e+00> : vector<16x16xf32>
    %22 = tpu.matmul %21, %2, %cst_22 {dimension_numbers = #tpu.dot_dimension_numbers<[1], [0], [0], [1], [0, 0, 1, 1], [], []>} : vector<16x32xbf16>, vector<32x16xbf16>, vector<16x16xf32> -> vector<16x16xf32>
    %23 = vector.broadcast %6 : vector<1x16xf32> to vector<16x16xf32>
    %24 = arith.addf %22, %23 : vector<16x16xf32>
    %cst_23 = arith.constant dense<0xFF800000> : vector<16xf32>
    %25 = vector.multi_reduction <maximumf>, %24, %cst_23 [1] : vector<16x16xf32> to vector<16xf32>
    %26 = vector.shape_cast %25 : vector<16xf32> to vector<16x1xf32>
    %27 = vector.broadcast %26 : vector<16x1xf32> to vector<16x16xf32>
    %28 = arith.subf %24, %27 : vector<16x16xf32>
    %29 = math.exp %28 : vector<16x16xf32>
    %cst_24 = arith.constant dense<0.000000e+00> : vector<16xf32>
    %30 = vector.multi_reduction <add>, %29, %cst_24 [1] : vector<16x16xf32> to vector<16xf32>
    %31 = vector.shape_cast %30 : vector<16xf32> to vector<16x1xf32>
    %32 = math.log %31 : vector<16x1xf32>
    %33 = vector.broadcast %26 : vector<16x1xf32> to vector<16x16xf32>
    %34 = arith.cmpf oeq, %24, %33 : vector<16x16xf32>
    %c16_i32 = arith.constant 16 : i32
    %35 = vector.broadcast %c16_i32 : i32 to vector<16x16xi32>
    %36 = arith.select %34, %12, %35 : vector<16x16xi1>, vector<16x16xi32>
    %cst_25 = arith.constant dense<2147483647> : vector<16xi32>
    %37 = vector.multi_reduction <minsi>, %36, %cst_25 [1] : vector<16x16xi32> to vector<16xi32>
    %38 = vector.shape_cast %37 : vector<16xi32> to vector<16x1xi32>
    %c0_26 = arith.constant 0 : index
    %c0_27 = arith.constant 0 : index
    %39 = vector.load %arg9[%c0_26, %c0_27] : memref<16x8xi32, #tpu.memory_space<vmem>>, vector<16x1xi32>
    tpu.vector_store %arg9[%c0_26, %c0_27], %38 {strides = array<i32>} : memref<16x8xi32, #tpu.memory_space<vmem>>, vector<16x1xi32>,
    %cst_28 = arith.constant 0.000000e+00 : f32
    %40 = vector.broadcast %cst_28 : f32 to vector<16x1xf32>
    %41 = arith.subf %40, %32 : vector<16x1xf32>
    %c0_29 = arith.constant 0 : index
    %c0_30 = arith.constant 0 : index
    %42 = vector.load %arg10[%c0_29, %c0_30] : memref<16x8xf32, #tpu.memory_space<vmem>>, vector<16x1xf32>
    tpu.vector_store %arg10[%c0_29, %c0_30], %41 {strides = array<i32>} : memref<16x8xf32, #tpu.memory_space<vmem>>, vector<16x1xf32>,
    %43 = arith.mulf %29, %28 : vector<16x16xf32>
    %cst_31 = arith.constant dense<0.000000e+00> : vector<16xf32>
    %44 = vector.multi_reduction <add>, %43, %cst_31 [1] : vector<16x16xf32> to vector<16xf32>
    %45 = vector.shape_cast %44 : vector<16xf32> to vector<16x1xf32>
    %46 = arith.divf %45, %31 : vector<16x1xf32>
    %47 = arith.subf %32, %46 : vector<16x1xf32>
    %c0_32 = arith.constant 0 : index
    %c0_33 = arith.constant 0 : index
    %48 = vector.load %arg11[%c0_32, %c0_33] : memref<16x8xf32, #tpu.memory_space<vmem>>, vector<16x1xf32>
    tpu.vector_store %arg11[%c0_32, %c0_33], %47 {strides = array<i32>} : memref<16x8xf32, #tpu.memory_space<vmem>>, vector<16x1xf32>,
    %49 = vector.broadcast %38 : vector<16x1xi32> to vector<16x16xi32>
    %50 = arith.cmpi eq, %12, %49 : vector<16x16xi32>
    %51 = arith.extui %50 : vector<16x16xi1> to vector<16x16xi32>
    %52 = arith.sitofp %51 : vector<16x16xi32> to vector<16x16xf32>
    %53 = arith.truncf %52 : vector<16x16xf32> to vector<16x16xbf16>
    %c0_34 = arith.constant 0 : index
    %c0_35 = arith.constant 0 : index
    %54 = vector.load %arg12[%c0_34, %c0_35] : memref<16x48xbf16, #tpu.memory_space<vmem>>, vector<16x16xbf16>
    tpu.vector_store %arg12[%c0_34, %c0_35], %53 {strides = array<i32>} : memref<16x48xbf16, #tpu.memory_space<vmem>>, vector<16x16xbf16>,
    %c0_36 = arith.constant 0 : index
    %c16_37 = arith.constant 16 : index
    %55 = vector.load %arg12[%c0_36, %c16_37] : memref<16x48xbf16, #tpu.memory_space<vmem>>, vector<16x32xbf16>
    tpu.vector_store %arg12[%c0_36, %c16_37], %21 {strides = array<i32>} : memref<16x48xbf16, #tpu.memory_space<vmem>>, vector<16x32xbf16>,
    %c0_38 = arith.constant 0 : index
    %c0_39 = arith.constant 0 : index
    %56 = vector.load %arg12[%c0_38, %c0_39] : memref<16x48xbf16, #tpu.memory_space<vmem>>, vector<16x48xbf16>
    %cst_40 = arith.constant dense<0.000000e+00> : vector<16x32xf32>
    %57 = tpu.matmul %56, %1, %cst_40 {dimension_numbers = #tpu.dot_dimension_numbers<[1], [0], [0], [1], [0, 0, 1, 1], [], []>} : vector<16x48xbf16>, vector<48x32xbf16>, vector<16x32xf32> -> vector<16x32xf32>
    %58 = vector.broadcast %5 : vector<1x32xf32> to vector<16x32xf32>
    %59 = arith.addf %57, %58 : vector<16x32xf32>
    %60 = math.tanh %59 : vector<16x32xf32>
    %61 = arith.truncf %60 : vector<16x32xf32> to vector<16x32xbf16>
    %cst_41 = arith.constant dense<0.000000e+00> : vector<16x16xf32>
    %62 = tpu.matmul %61, %2, %cst_41 {dimension_numbers = #tpu.dot_dimension_numbers<[1], [0], [0], [1], [0, 0, 1, 1], [], []>} : vector<16x32xbf16>, vector<32x16xbf16>, vector<16x16xf32> -> vector<16x16xf32>
    %63 = vector.broadcast %6 : vector<1x16xf32> to vector<16x16xf32>
    %64 = arith.addf %62, %63 : vector<16x16xf32>
    %cst_42 = arith.constant dense<0xFF800000> : vector<16xf32>
    %65 = vector.multi_reduction <maximumf>, %64, %cst_42 [1] : vector<16x16xf32> to vector<16xf32>
    %66 = vector.shape_cast %65 : vector<16xf32> to vector<16x1xf32>
    %67 = vector.broadcast %66 : vector<16x1xf32> to vector<16x16xf32>
    %68 = arith.subf %64, %67 : vector<16x16xf32>
    %69 = math.exp %68 : vector<16x16xf32>
    %cst_43 = arith.constant dense<0.000000e+00> : vector<16xf32>
    %70 = vector.multi_reduction <add>, %69, %cst_43 [1] : vector<16x16xf32> to vector<16xf32>
    %71 = vector.shape_cast %70 : vector<16xf32> to vector<16x1xf32>
    %72 = math.log %71 : vector<16x1xf32>
    %73 = vector.broadcast %66 : vector<16x1xf32> to vector<16x16xf32>
    %74 = arith.cmpf oeq, %64, %73 : vector<16x16xf32>
    %c16_i32_44 = arith.constant 16 : i32
    %75 = vector.broadcast %c16_i32_44 : i32 to vector<16x16xi32>
    %76 = arith.select %74, %12, %75 : vector<16x16xi1>, vector<16x16xi32>
    %cst_45 = arith.constant dense<2147483647> : vector<16xi32>
    %77 = vector.multi_reduction <minsi>, %76, %cst_45 [1] : vector<16x16xi32> to vector<16xi32>
    %78 = vector.shape_cast %77 : vector<16xi32> to vector<16x1xi32>
    %c0_46 = arith.constant 0 : index
    %c1 = arith.constant 1 : index
    %79 = vector.load %arg9[%c0_46, %c1] : memref<16x8xi32, #tpu.memory_space<vmem>>, vector<16x1xi32>
    tpu.vector_store %arg9[%c0_46, %c1], %78 {strides = array<i32>} : memref<16x8xi32, #tpu.memory_space<vmem>>, vector<16x1xi32>,
    %cst_47 = arith.constant 0.000000e+00 : f32
    %80 = vector.broadcast %cst_47 : f32 to vector<16x1xf32>
    %81 = arith.subf %80, %72 : vector<16x1xf32>
    %c0_48 = arith.constant 0 : index
    %c1_49 = arith.constant 1 : index
    %82 = vector.load %arg10[%c0_48, %c1_49] : memref<16x8xf32, #tpu.memory_space<vmem>>, vector<16x1xf32>
    tpu.vector_store %arg10[%c0_48, %c1_49], %81 {strides = array<i32>} : memref<16x8xf32, #tpu.memory_space<vmem>>, vector<16x1xf32>,
    %83 = arith.mulf %69, %68 : vector<16x16xf32>
    %cst_50 = arith.constant dense<0.000000e+00> : vector<16xf32>
    %84 = vector.multi_reduction <add>, %83, %cst_50 [1] : vector<16x16xf32> to vector<16xf32>
    %85 = vector.shape_cast %84 : vector<16xf32> to vector<16x1xf32>
    %86 = arith.divf %85, %71 : vector<16x1xf32>
    %87 = arith.subf %72, %86 : vector<16x1xf32>
    %c0_51 = arith.constant 0 : index
    %c1_52 = arith.constant 1 : index
    %88 = vector.load %arg11[%c0_51, %c1_52] : memref<16x8xf32, #tpu.memory_space<vmem>>, vector<16x1xf32>
    tpu.vector_store %arg11[%c0_51, %c1_52], %87 {strides = array<i32>} : memref<16x8xf32, #tpu.memory_space<vmem>>, vector<16x1xf32>,
    %89 = vector.broadcast %78 : vector<16x1xi32> to vector<16x16xi32>
    %90 = arith.cmpi eq, %12, %89 : vector<16x16xi32>
    %91 = arith.extui %90 : vector<16x16xi1> to vector<16x16xi32>
    %92 = arith.sitofp %91 : vector<16x16xi32> to vector<16x16xf32>
    %93 = arith.truncf %92 : vector<16x16xf32> to vector<16x16xbf16>
    %c0_53 = arith.constant 0 : index
    %c0_54 = arith.constant 0 : index
    %94 = vector.load %arg12[%c0_53, %c0_54] : memref<16x48xbf16, #tpu.memory_space<vmem>>, vector<16x16xbf16>
    tpu.vector_store %arg12[%c0_53, %c0_54], %93 {strides = array<i32>} : memref<16x48xbf16, #tpu.memory_space<vmem>>, vector<16x16xbf16>,
    %c0_55 = arith.constant 0 : index
    %c16_56 = arith.constant 16 : index
    %95 = vector.load %arg12[%c0_55, %c16_56] : memref<16x48xbf16, #tpu.memory_space<vmem>>, vector<16x32xbf16>
    tpu.vector_store %arg12[%c0_55, %c16_56], %61 {strides = array<i32>} : memref<16x48xbf16, #tpu.memory_space<vmem>>, vector<16x32xbf16>,
    %c0_57 = arith.constant 0 : index
    %c0_58 = arith.constant 0 : index
    %96 = vector.load %arg12[%c0_57, %c0_58] : memref<16x48xbf16, #tpu.memory_space<vmem>>, vector<16x48xbf16>
    %cst_59 = arith.constant dense<0.000000e+00> : vector<16x32xf32>
    %97 = tpu.matmul %96, %1, %cst_59 {dimension_numbers = #tpu.dot_dimension_numbers<[1], [0], [0], [1], [0, 0, 1, 1], [], []>} : vector<16x48xbf16>, vector<48x32xbf16>, vector<16x32xf32> -> vector<16x32xf32>
    %98 = vector.broadcast %5 : vector<1x32xf32> to vector<16x32xf32>
    %99 = arith.addf %97, %98 : vector<16x32xf32>
    %100 = math.tanh %99 : vector<16x32xf32>
    %101 = arith.truncf %100 : vector<16x32xf32> to vector<16x32xbf16>
    %cst_60 = arith.constant dense<0.000000e+00> : vector<16x16xf32>
    %102 = tpu.matmul %101, %2, %cst_60 {dimension_numbers = #tpu.dot_dimension_numbers<[1], [0], [0], [1], [0, 0, 1, 1], [], []>} : vector<16x32xbf16>, vector<32x16xbf16>, vector<16x16xf32> -> vector<16x16xf32>
    %103 = vector.broadcast %6 : vector<1x16xf32> to vector<16x16xf32>
    %104 = arith.addf %102, %103 : vector<16x16xf32>
    %cst_61 = arith.constant dense<0xFF800000> : vector<16xf32>
    %105 = vector.multi_reduction <maximumf>, %104, %cst_61 [1] : vector<16x16xf32> to vector<16xf32>
    %106 = vector.shape_cast %105 : vector<16xf32> to vector<16x1xf32>
    %107 = vector.broadcast %106 : vector<16x1xf32> to vector<16x16xf32>
    %108 = arith.subf %104, %107 : vector<16x16xf32>
    %109 = math.exp %108 : vector<16x16xf32>
    %cst_62 = arith.constant dense<0.000000e+00> : vector<16xf32>
    %110 = vector.multi_reduction <add>, %109, %cst_62 [1] : vector<16x16xf32> to vector<16xf32>
    %111 = vector.shape_cast %110 : vector<16xf32> to vector<16x1xf32>
    %112 = math.log %111 : vector<16x1xf32>
    %113 = vector.broadcast %106 : vector<16x1xf32> to vector<16x16xf32>
    %114 = arith.cmpf oeq, %104, %113 : vector<16x16xf32>
    %c16_i32_63 = arith.constant 16 : i32
    %115 = vector.broadcast %c16_i32_63 : i32 to vector<16x16xi32>
    %116 = arith.select %114, %12, %115 : vector<16x16xi1>, vector<16x16xi32>
    %cst_64 = arith.constant dense<2147483647> : vector<16xi32>
    %117 = vector.multi_reduction <minsi>, %116, %cst_64 [1] : vector<16x16xi32> to vector<16xi32>
    %118 = vector.shape_cast %117 : vector<16xi32> to vector<16x1xi32>
    %c0_65 = arith.constant 0 : index
    %c2 = arith.constant 2 : index
    %119 = vector.load %arg9[%c0_65, %c2] : memref<16x8xi32, #tpu.memory_space<vmem>>, vector<16x1xi32>
    tpu.vector_store %arg9[%c0_65, %c2], %118 {strides = array<i32>} : memref<16x8xi32, #tpu.memory_space<vmem>>, vector<16x1xi32>,
    %cst_66 = arith.constant 0.000000e+00 : f32
    %120 = vector.broadcast %cst_66 : f32 to vector<16x1xf32>
    %121 = arith.subf %120, %112 : vector<16x1xf32>
    %c0_67 = arith.constant 0 : index
    %c2_68 = arith.constant 2 : index
    %122 = vector.load %arg10[%c0_67, %c2_68] : memref<16x8xf32, #tpu.memory_space<vmem>>, vector<16x1xf32>
    tpu.vector_store %arg10[%c0_67, %c2_68], %121 {strides = array<i32>} : memref<16x8xf32, #tpu.memory_space<vmem>>, vector<16x1xf32>,
    %123 = arith.mulf %109, %108 : vector<16x16xf32>
    %cst_69 = arith.constant dense<0.000000e+00> : vector<16xf32>
    %124 = vector.multi_reduction <add>, %123, %cst_69 [1] : vector<16x16xf32> to vector<16xf32>
    %125 = vector.shape_cast %124 : vector<16xf32> to vector<16x1xf32>
    %126 = arith.divf %125, %111 : vector<16x1xf32>
    %127 = arith.subf %112, %126 : vector<16x1xf32>
    %c0_70 = arith.constant 0 : index
    %c2_71 = arith.constant 2 : index
    %128 = vector.load %arg11[%c0_70, %c2_71] : memref<16x8xf32, #tpu.memory_space<vmem>>, vector<16x1xf32>
    tpu.vector_store %arg11[%c0_70, %c2_71], %127 {strides = array<i32>} : memref<16x8xf32, #tpu.memory_space<vmem>>, vector<16x1xf32>,
    %129 = vector.broadcast %118 : vector<16x1xi32> to vector<16x16xi32>
    %130 = arith.cmpi eq, %12, %129 : vector<16x16xi32>
    %131 = arith.extui %130 : vector<16x16xi1> to vector<16x16xi32>
    %132 = arith.sitofp %131 : vector<16x16xi32> to vector<16x16xf32>
    %133 = arith.truncf %132 : vector<16x16xf32> to vector<16x16xbf16>
    %c0_72 = arith.constant 0 : index
    %c0_73 = arith.constant 0 : index
    %134 = vector.load %arg12[%c0_72, %c0_73] : memref<16x48xbf16, #tpu.memory_space<vmem>>, vector<16x16xbf16>
    tpu.vector_store %arg12[%c0_72, %c0_73], %133 {strides = array<i32>} : memref<16x48xbf16, #tpu.memory_space<vmem>>, vector<16x16xbf16>,
    %c0_74 = arith.constant 0 : index
    %c16_75 = arith.constant 16 : index
    %135 = vector.load %arg12[%c0_74, %c16_75] : memref<16x48xbf16, #tpu.memory_space<vmem>>, vector<16x32xbf16>
    tpu.vector_store %arg12[%c0_74, %c16_75], %101 {strides = array<i32>} : memref<16x48xbf16, #tpu.memory_space<vmem>>, vector<16x32xbf16>,
    %c0_76 = arith.constant 0 : index
    %c0_77 = arith.constant 0 : index
    %136 = vector.load %arg12[%c0_76, %c0_77] : memref<16x48xbf16, #tpu.memory_space<vmem>>, vector<16x48xbf16>
    %cst_78 = arith.constant dense<0.000000e+00> : vector<16x32xf32>
    %137 = tpu.matmul %136, %1, %cst_78 {dimension_numbers = #tpu.dot_dimension_numbers<[1], [0], [0], [1], [0, 0, 1, 1], [], []>} : vector<16x48xbf16>, vector<48x32xbf16>, vector<16x32xf32> -> vector<16x32xf32>
    %138 = vector.broadcast %5 : vector<1x32xf32> to vector<16x32xf32>
    %139 = arith.addf %137, %138 : vector<16x32xf32>
    %140 = math.tanh %139 : vector<16x32xf32>
    %141 = arith.truncf %140 : vector<16x32xf32> to vector<16x32xbf16>
    %cst_79 = arith.constant dense<0.000000e+00> : vector<16x16xf32>
    %142 = tpu.matmul %141, %2, %cst_79 {dimension_numbers = #tpu.dot_dimension_numbers<[1], [0], [0], [1], [0, 0, 1, 1], [], []>} : vector<16x32xbf16>, vector<32x16xbf16>, vector<16x16xf32> -> vector<16x16xf32>
    %143 = vector.broadcast %6 : vector<1x16xf32> to vector<16x16xf32>
    %144 = arith.addf %142, %143 : vector<16x16xf32>
    %cst_80 = arith.constant dense<0xFF800000> : vector<16xf32>
    %145 = vector.multi_reduction <maximumf>, %144, %cst_80 [1] : vector<16x16xf32> to vector<16xf32>
    %146 = vector.shape_cast %145 : vector<16xf32> to vector<16x1xf32>
    %147 = vector.broadcast %146 : vector<16x1xf32> to vector<16x16xf32>
    %148 = arith.subf %144, %147 : vector<16x16xf32>
    %149 = math.exp %148 : vector<16x16xf32>
    %cst_81 = arith.constant dense<0.000000e+00> : vector<16xf32>
    %150 = vector.multi_reduction <add>, %149, %cst_81 [1] : vector<16x16xf32> to vector<16xf32>
    %151 = vector.shape_cast %150 : vector<16xf32> to vector<16x1xf32>
    %152 = math.log %151 : vector<16x1xf32>
    %153 = vector.broadcast %146 : vector<16x1xf32> to vector<16x16xf32>
    %154 = arith.cmpf oeq, %144, %153 : vector<16x16xf32>
    %c16_i32_82 = arith.constant 16 : i32
    %155 = vector.broadcast %c16_i32_82 : i32 to vector<16x16xi32>
    %156 = arith.select %154, %12, %155 : vector<16x16xi1>, vector<16x16xi32>
    %cst_83 = arith.constant dense<2147483647> : vector<16xi32>
    %157 = vector.multi_reduction <minsi>, %156, %cst_83 [1] : vector<16x16xi32> to vector<16xi32>
    %158 = vector.shape_cast %157 : vector<16xi32> to vector<16x1xi32>
    %c0_84 = arith.constant 0 : index
    %c3 = arith.constant 3 : index
    %159 = vector.load %arg9[%c0_84, %c3] : memref<16x8xi32, #tpu.memory_space<vmem>>, vector<16x1xi32>
    tpu.vector_store %arg9[%c0_84, %c3], %158 {strides = array<i32>} : memref<16x8xi32, #tpu.memory_space<vmem>>, vector<16x1xi32>,
    %cst_85 = arith.constant 0.000000e+00 : f32
    %160 = vector.broadcast %cst_85 : f32 to vector<16x1xf32>
    %161 = arith.subf %160, %152 : vector<16x1xf32>
    %c0_86 = arith.constant 0 : index
    %c3_87 = arith.constant 3 : index
    %162 = vector.load %arg10[%c0_86, %c3_87] : memref<16x8xf32, #tpu.memory_space<vmem>>, vector<16x1xf32>
    tpu.vector_store %arg10[%c0_86, %c3_87], %161 {strides = array<i32>} : memref<16x8xf32, #tpu.memory_space<vmem>>, vector<16x1xf32>,
    %163 = arith.mulf %149, %148 : vector<16x16xf32>
    %cst_88 = arith.constant dense<0.000000e+00> : vector<16xf32>
    %164 = vector.multi_reduction <add>, %163, %cst_88 [1] : vector<16x16xf32> to vector<16xf32>
    %165 = vector.shape_cast %164 : vector<16xf32> to vector<16x1xf32>
    %166 = arith.divf %165, %151 : vector<16x1xf32>
    %167 = arith.subf %152, %166 : vector<16x1xf32>
    %c0_89 = arith.constant 0 : index
    %c3_90 = arith.constant 3 : index
    %168 = vector.load %arg11[%c0_89, %c3_90] : memref<16x8xf32, #tpu.memory_space<vmem>>, vector<16x1xf32>
    tpu.vector_store %arg11[%c0_89, %c3_90], %167 {strides = array<i32>} : memref<16x8xf32, #tpu.memory_space<vmem>>, vector<16x1xf32>,
    %169 = vector.broadcast %158 : vector<16x1xi32> to vector<16x16xi32>
    %170 = arith.cmpi eq, %12, %169 : vector<16x16xi32>
    %171 = arith.extui %170 : vector<16x16xi1> to vector<16x16xi32>
    %172 = arith.sitofp %171 : vector<16x16xi32> to vector<16x16xf32>
    %173 = arith.truncf %172 : vector<16x16xf32> to vector<16x16xbf16>
    %c0_91 = arith.constant 0 : index
    %c0_92 = arith.constant 0 : index
    %174 = vector.load %arg12[%c0_91, %c0_92] : memref<16x48xbf16, #tpu.memory_space<vmem>>, vector<16x16xbf16>
    tpu.vector_store %arg12[%c0_91, %c0_92], %173 {strides = array<i32>} : memref<16x48xbf16, #tpu.memory_space<vmem>>, vector<16x16xbf16>,
    %c0_93 = arith.constant 0 : index
    %c16_94 = arith.constant 16 : index
    %175 = vector.load %arg12[%c0_93, %c16_94] : memref<16x48xbf16, #tpu.memory_space<vmem>>, vector<16x32xbf16>
    tpu.vector_store %arg12[%c0_93, %c16_94], %141 {strides = array<i32>} : memref<16x48xbf16, #tpu.memory_space<vmem>>, vector<16x32xbf16>,
    %c0_95 = arith.constant 0 : index
    %c0_96 = arith.constant 0 : index
    %176 = vector.load %arg12[%c0_95, %c0_96] : memref<16x48xbf16, #tpu.memory_space<vmem>>, vector<16x48xbf16>
    %cst_97 = arith.constant dense<0.000000e+00> : vector<16x32xf32>
    %177 = tpu.matmul %176, %1, %cst_97 {dimension_numbers = #tpu.dot_dimension_numbers<[1], [0], [0], [1], [0, 0, 1, 1], [], []>} : vector<16x48xbf16>, vector<48x32xbf16>, vector<16x32xf32> -> vector<16x32xf32>
    %178 = vector.broadcast %5 : vector<1x32xf32> to vector<16x32xf32>
    %179 = arith.addf %177, %178 : vector<16x32xf32>
    %180 = math.tanh %179 : vector<16x32xf32>
    %181 = arith.truncf %180 : vector<16x32xf32> to vector<16x32xbf16>
    %cst_98 = arith.constant dense<0.000000e+00> : vector<16x16xf32>
    %182 = tpu.matmul %181, %2, %cst_98 {dimension_numbers = #tpu.dot_dimension_numbers<[1], [0], [0], [1], [0, 0, 1, 1], [], []>} : vector<16x32xbf16>, vector<32x16xbf16>, vector<16x16xf32> -> vector<16x16xf32>
    %183 = vector.broadcast %6 : vector<1x16xf32> to vector<16x16xf32>
    %184 = arith.addf %182, %183 : vector<16x16xf32>
    %cst_99 = arith.constant dense<0xFF800000> : vector<16xf32>
    %185 = vector.multi_reduction <maximumf>, %184, %cst_99 [1] : vector<16x16xf32> to vector<16xf32>
    %186 = vector.shape_cast %185 : vector<16xf32> to vector<16x1xf32>
    %187 = vector.broadcast %186 : vector<16x1xf32> to vector<16x16xf32>
    %188 = arith.subf %184, %187 : vector<16x16xf32>
    %189 = math.exp %188 : vector<16x16xf32>
    %cst_100 = arith.constant dense<0.000000e+00> : vector<16xf32>
    %190 = vector.multi_reduction <add>, %189, %cst_100 [1] : vector<16x16xf32> to vector<16xf32>
    %191 = vector.shape_cast %190 : vector<16xf32> to vector<16x1xf32>
    %192 = math.log %191 : vector<16x1xf32>
    %193 = vector.broadcast %186 : vector<16x1xf32> to vector<16x16xf32>
    %194 = arith.cmpf oeq, %184, %193 : vector<16x16xf32>
    %c16_i32_101 = arith.constant 16 : i32
    %195 = vector.broadcast %c16_i32_101 : i32 to vector<16x16xi32>
    %196 = arith.select %194, %12, %195 : vector<16x16xi1>, vector<16x16xi32>
    %cst_102 = arith.constant dense<2147483647> : vector<16xi32>
    %197 = vector.multi_reduction <minsi>, %196, %cst_102 [1] : vector<16x16xi32> to vector<16xi32>
    %198 = vector.shape_cast %197 : vector<16xi32> to vector<16x1xi32>
    %c0_103 = arith.constant 0 : index
    %c4 = arith.constant 4 : index
    %199 = vector.load %arg9[%c0_103, %c4] : memref<16x8xi32, #tpu.memory_space<vmem>>, vector<16x1xi32>
    tpu.vector_store %arg9[%c0_103, %c4], %198 {strides = array<i32>} : memref<16x8xi32, #tpu.memory_space<vmem>>, vector<16x1xi32>,
    %cst_104 = arith.constant 0.000000e+00 : f32
    %200 = vector.broadcast %cst_104 : f32 to vector<16x1xf32>
    %201 = arith.subf %200, %192 : vector<16x1xf32>
    %c0_105 = arith.constant 0 : index
    %c4_106 = arith.constant 4 : index
    %202 = vector.load %arg10[%c0_105, %c4_106] : memref<16x8xf32, #tpu.memory_space<vmem>>, vector<16x1xf32>
    tpu.vector_store %arg10[%c0_105, %c4_106], %201 {strides = array<i32>} : memref<16x8xf32, #tpu.memory_space<vmem>>, vector<16x1xf32>,
    %203 = arith.mulf %189, %188 : vector<16x16xf32>
    %cst_107 = arith.constant dense<0.000000e+00> : vector<16xf32>
    %204 = vector.multi_reduction <add>, %203, %cst_107 [1] : vector<16x16xf32> to vector<16xf32>
    %205 = vector.shape_cast %204 : vector<16xf32> to vector<16x1xf32>
    %206 = arith.divf %205, %191 : vector<16x1xf32>
    %207 = arith.subf %192, %206 : vector<16x1xf32>
    %c0_108 = arith.constant 0 : index
    %c4_109 = arith.constant 4 : index
    %208 = vector.load %arg11[%c0_108, %c4_109] : memref<16x8xf32, #tpu.memory_space<vmem>>, vector<16x1xf32>
    tpu.vector_store %arg11[%c0_108, %c4_109], %207 {strides = array<i32>} : memref<16x8xf32, #tpu.memory_space<vmem>>, vector<16x1xf32>,
    %209 = vector.broadcast %198 : vector<16x1xi32> to vector<16x16xi32>
    %210 = arith.cmpi eq, %12, %209 : vector<16x16xi32>
    %211 = arith.extui %210 : vector<16x16xi1> to vector<16x16xi32>
    %212 = arith.sitofp %211 : vector<16x16xi32> to vector<16x16xf32>
    %213 = arith.truncf %212 : vector<16x16xf32> to vector<16x16xbf16>
    %c0_110 = arith.constant 0 : index
    %c0_111 = arith.constant 0 : index
    %214 = vector.load %arg12[%c0_110, %c0_111] : memref<16x48xbf16, #tpu.memory_space<vmem>>, vector<16x16xbf16>
    tpu.vector_store %arg12[%c0_110, %c0_111], %213 {strides = array<i32>} : memref<16x48xbf16, #tpu.memory_space<vmem>>, vector<16x16xbf16>,
    %c0_112 = arith.constant 0 : index
    %c16_113 = arith.constant 16 : index
    %215 = vector.load %arg12[%c0_112, %c16_113] : memref<16x48xbf16, #tpu.memory_space<vmem>>, vector<16x32xbf16>
    tpu.vector_store %arg12[%c0_112, %c16_113], %181 {strides = array<i32>} : memref<16x48xbf16, #tpu.memory_space<vmem>>, vector<16x32xbf16>,
    %c0_114 = arith.constant 0 : index
    %c0_115 = arith.constant 0 : index
    %216 = vector.load %arg12[%c0_114, %c0_115] : memref<16x48xbf16, #tpu.memory_space<vmem>>, vector<16x48xbf16>
    %cst_116 = arith.constant dense<0.000000e+00> : vector<16x32xf32>
    %217 = tpu.matmul %216, %1, %cst_116 {dimension_numbers = #tpu.dot_dimension_numbers<[1], [0], [0], [1], [0, 0, 1, 1], [], []>} : vector<16x48xbf16>, vector<48x32xbf16>, vector<16x32xf32> -> vector<16x32xf32>
    %218 = vector.broadcast %5 : vector<1x32xf32> to vector<16x32xf32>
    %219 = arith.addf %217, %218 : vector<16x32xf32>
    %220 = math.tanh %219 : vector<16x32xf32>
    %221 = arith.truncf %220 : vector<16x32xf32> to vector<16x32xbf16>
    %cst_117 = arith.constant dense<0.000000e+00> : vector<16x16xf32>
    %222 = tpu.matmul %221, %2, %cst_117 {dimension_numbers = #tpu.dot_dimension_numbers<[1], [0], [0], [1], [0, 0, 1, 1], [], []>} : vector<16x32xbf16>, vector<32x16xbf16>, vector<16x16xf32> -> vector<16x16xf32>
    %223 = vector.broadcast %6 : vector<1x16xf32> to vector<16x16xf32>
    %224 = arith.addf %222, %223 : vector<16x16xf32>
    %cst_118 = arith.constant dense<0xFF800000> : vector<16xf32>
    %225 = vector.multi_reduction <maximumf>, %224, %cst_118 [1] : vector<16x16xf32> to vector<16xf32>
    %226 = vector.shape_cast %225 : vector<16xf32> to vector<16x1xf32>
    %227 = vector.broadcast %226 : vector<16x1xf32> to vector<16x16xf32>
    %228 = arith.subf %224, %227 : vector<16x16xf32>
    %229 = math.exp %228 : vector<16x16xf32>
    %cst_119 = arith.constant dense<0.000000e+00> : vector<16xf32>
    %230 = vector.multi_reduction <add>, %229, %cst_119 [1] : vector<16x16xf32> to vector<16xf32>
    %231 = vector.shape_cast %230 : vector<16xf32> to vector<16x1xf32>
    %232 = math.log %231 : vector<16x1xf32>
    %233 = vector.broadcast %226 : vector<16x1xf32> to vector<16x16xf32>
    %234 = arith.cmpf oeq, %224, %233 : vector<16x16xf32>
    %c16_i32_120 = arith.constant 16 : i32
    %235 = vector.broadcast %c16_i32_120 : i32 to vector<16x16xi32>
    %236 = arith.select %234, %12, %235 : vector<16x16xi1>, vector<16x16xi32>
    %cst_121 = arith.constant dense<2147483647> : vector<16xi32>
    %237 = vector.multi_reduction <minsi>, %236, %cst_121 [1] : vector<16x16xi32> to vector<16xi32>
    %238 = vector.shape_cast %237 : vector<16xi32> to vector<16x1xi32>
    %c0_122 = arith.constant 0 : index
    %c5 = arith.constant 5 : index
    %239 = vector.load %arg9[%c0_122, %c5] : memref<16x8xi32, #tpu.memory_space<vmem>>, vector<16x1xi32>
    tpu.vector_store %arg9[%c0_122, %c5], %238 {strides = array<i32>} : memref<16x8xi32, #tpu.memory_space<vmem>>, vector<16x1xi32>,
    %cst_123 = arith.constant 0.000000e+00 : f32
    %240 = vector.broadcast %cst_123 : f32 to vector<16x1xf32>
    %241 = arith.subf %240, %232 : vector<16x1xf32>
    %c0_124 = arith.constant 0 : index
    %c5_125 = arith.constant 5 : index
    %242 = vector.load %arg10[%c0_124, %c5_125] : memref<16x8xf32, #tpu.memory_space<vmem>>, vector<16x1xf32>
    tpu.vector_store %arg10[%c0_124, %c5_125], %241 {strides = array<i32>} : memref<16x8xf32, #tpu.memory_space<vmem>>, vector<16x1xf32>,
    %243 = arith.mulf %229, %228 : vector<16x16xf32>
    %cst_126 = arith.constant dense<0.000000e+00> : vector<16xf32>
    %244 = vector.multi_reduction <add>, %243, %cst_126 [1] : vector<16x16xf32> to vector<16xf32>
    %245 = vector.shape_cast %244 : vector<16xf32> to vector<16x1xf32>
    %246 = arith.divf %245, %231 : vector<16x1xf32>
    %247 = arith.subf %232, %246 : vector<16x1xf32>
    %c0_127 = arith.constant 0 : index
    %c5_128 = arith.constant 5 : index
    %248 = vector.load %arg11[%c0_127, %c5_128] : memref<16x8xf32, #tpu.memory_space<vmem>>, vector<16x1xf32>
    tpu.vector_store %arg11[%c0_127, %c5_128], %247 {strides = array<i32>} : memref<16x8xf32, #tpu.memory_space<vmem>>, vector<16x1xf32>,
    %249 = vector.broadcast %238 : vector<16x1xi32> to vector<16x16xi32>
    %250 = arith.cmpi eq, %12, %249 : vector<16x16xi32>
    %251 = arith.extui %250 : vector<16x16xi1> to vector<16x16xi32>
    %252 = arith.sitofp %251 : vector<16x16xi32> to vector<16x16xf32>
    %253 = arith.truncf %252 : vector<16x16xf32> to vector<16x16xbf16>
    %c0_129 = arith.constant 0 : index
    %c0_130 = arith.constant 0 : index
    %254 = vector.load %arg12[%c0_129, %c0_130] : memref<16x48xbf16, #tpu.memory_space<vmem>>, vector<16x16xbf16>
    tpu.vector_store %arg12[%c0_129, %c0_130], %253 {strides = array<i32>} : memref<16x48xbf16, #tpu.memory_space<vmem>>, vector<16x16xbf16>,
    %c0_131 = arith.constant 0 : index
    %c16_132 = arith.constant 16 : index
    %255 = vector.load %arg12[%c0_131, %c16_132] : memref<16x48xbf16, #tpu.memory_space<vmem>>, vector<16x32xbf16>
    tpu.vector_store %arg12[%c0_131, %c16_132], %221 {strides = array<i32>} : memref<16x48xbf16, #tpu.memory_space<vmem>>, vector<16x32xbf16>,
    %c0_133 = arith.constant 0 : index
    %c0_134 = arith.constant 0 : index
    %256 = vector.load %arg12[%c0_133, %c0_134] : memref<16x48xbf16, #tpu.memory_space<vmem>>, vector<16x48xbf16>
    %cst_135 = arith.constant dense<0.000000e+00> : vector<16x32xf32>
    %257 = tpu.matmul %256, %1, %cst_135 {dimension_numbers = #tpu.dot_dimension_numbers<[1], [0], [0], [1], [0, 0, 1, 1], [], []>} : vector<16x48xbf16>, vector<48x32xbf16>, vector<16x32xf32> -> vector<16x32xf32>
    %258 = vector.broadcast %5 : vector<1x32xf32> to vector<16x32xf32>
    %259 = arith.addf %257, %258 : vector<16x32xf32>
    %260 = math.tanh %259 : vector<16x32xf32>
    %261 = arith.truncf %260 : vector<16x32xf32> to vector<16x32xbf16>
    %cst_136 = arith.constant dense<0.000000e+00> : vector<16x16xf32>
    %262 = tpu.matmul %261, %2, %cst_136 {dimension_numbers = #tpu.dot_dimension_numbers<[1], [0], [0], [1], [0, 0, 1, 1], [], []>} : vector<16x32xbf16>, vector<32x16xbf16>, vector<16x16xf32> -> vector<16x16xf32>
    %263 = vector.broadcast %6 : vector<1x16xf32> to vector<16x16xf32>
    %264 = arith.addf %262, %263 : vector<16x16xf32>
    %cst_137 = arith.constant dense<0xFF800000> : vector<16xf32>
    %265 = vector.multi_reduction <maximumf>, %264, %cst_137 [1] : vector<16x16xf32> to vector<16xf32>
    %266 = vector.shape_cast %265 : vector<16xf32> to vector<16x1xf32>
    %267 = vector.broadcast %266 : vector<16x1xf32> to vector<16x16xf32>
    %268 = arith.subf %264, %267 : vector<16x16xf32>
    %269 = math.exp %268 : vector<16x16xf32>
    %cst_138 = arith.constant dense<0.000000e+00> : vector<16xf32>
    %270 = vector.multi_reduction <add>, %269, %cst_138 [1] : vector<16x16xf32> to vector<16xf32>
    %271 = vector.shape_cast %270 : vector<16xf32> to vector<16x1xf32>
    %272 = math.log %271 : vector<16x1xf32>
    %273 = vector.broadcast %266 : vector<16x1xf32> to vector<16x16xf32>
    %274 = arith.cmpf oeq, %264, %273 : vector<16x16xf32>
    %c16_i32_139 = arith.constant 16 : i32
    %275 = vector.broadcast %c16_i32_139 : i32 to vector<16x16xi32>
    %276 = arith.select %274, %12, %275 : vector<16x16xi1>, vector<16x16xi32>
    %cst_140 = arith.constant dense<2147483647> : vector<16xi32>
    %277 = vector.multi_reduction <minsi>, %276, %cst_140 [1] : vector<16x16xi32> to vector<16xi32>
    %278 = vector.shape_cast %277 : vector<16xi32> to vector<16x1xi32>
    %c0_141 = arith.constant 0 : index
    %c6 = arith.constant 6 : index
    %279 = vector.load %arg9[%c0_141, %c6] : memref<16x8xi32, #tpu.memory_space<vmem>>, vector<16x1xi32>
    tpu.vector_store %arg9[%c0_141, %c6], %278 {strides = array<i32>} : memref<16x8xi32, #tpu.memory_space<vmem>>, vector<16x1xi32>,
    %cst_142 = arith.constant 0.000000e+00 : f32
    %280 = vector.broadcast %cst_142 : f32 to vector<16x1xf32>
    %281 = arith.subf %280, %272 : vector<16x1xf32>
    %c0_143 = arith.constant 0 : index
    %c6_144 = arith.constant 6 : index
    %282 = vector.load %arg10[%c0_143, %c6_144] : memref<16x8xf32, #tpu.memory_space<vmem>>, vector<16x1xf32>
    tpu.vector_store %arg10[%c0_143, %c6_144], %281 {strides = array<i32>} : memref<16x8xf32, #tpu.memory_space<vmem>>, vector<16x1xf32>,
    %283 = arith.mulf %269, %268 : vector<16x16xf32>
    %cst_145 = arith.constant dense<0.000000e+00> : vector<16xf32>
    %284 = vector.multi_reduction <add>, %283, %cst_145 [1] : vector<16x16xf32> to vector<16xf32>
    %285 = vector.shape_cast %284 : vector<16xf32> to vector<16x1xf32>
    %286 = arith.divf %285, %271 : vector<16x1xf32>
    %287 = arith.subf %272, %286 : vector<16x1xf32>
    %c0_146 = arith.constant 0 : index
    %c6_147 = arith.constant 6 : index
    %288 = vector.load %arg11[%c0_146, %c6_147] : memref<16x8xf32, #tpu.memory_space<vmem>>, vector<16x1xf32>
    tpu.vector_store %arg11[%c0_146, %c6_147], %287 {strides = array<i32>} : memref<16x8xf32, #tpu.memory_space<vmem>>, vector<16x1xf32>,
    %c0_i32 = arith.constant 0 : i32
    %289 = vector.broadcast %c0_i32 : i32 to vector<16x1xi32>
    %c0_148 = arith.constant 0 : index
    %c7 = arith.constant 7 : index
    %290 = vector.load %arg9[%c0_148, %c7] : memref<16x8xi32, #tpu.memory_space<vmem>>, vector<16x1xi32>
    tpu.vector_store %arg9[%c0_148, %c7], %289 {strides = array<i32>} : memref<16x8xi32, #tpu.memory_space<vmem>>, vector<16x1xi32>,
    %cst_149 = arith.constant 0.000000e+00 : f32
    %291 = vector.broadcast %cst_149 : f32 to vector<16x1xf32>
    %c0_150 = arith.constant 0 : index
    %c7_151 = arith.constant 7 : index
    %292 = vector.load %arg10[%c0_150, %c7_151] : memref<16x8xf32, #tpu.memory_space<vmem>>, vector<16x1xf32>
    tpu.vector_store %arg10[%c0_150, %c7_151], %291 {strides = array<i32>} : memref<16x8xf32, #tpu.memory_space<vmem>>, vector<16x1xf32>,
    %cst_152 = arith.constant 0.000000e+00 : f32
    %293 = vector.broadcast %cst_152 : f32 to vector<16x1xf32>
    %c0_153 = arith.constant 0 : index
    %c7_154 = arith.constant 7 : index
    %294 = vector.load %arg11[%c0_153, %c7_154] : memref<16x8xf32, #tpu.memory_space<vmem>>, vector<16x1xf32>
    tpu.vector_store %arg11[%c0_153, %c7_154], %293 {strides = array<i32>} : memref<16x8xf32, #tpu.memory_space<vmem>>, vector<16x1xf32>,
    return
  }
  func.func @transform_0(%arg0: i32) -> (i32, i32) {
    %c0_i32 = arith.constant 0 : i32
    %c0_i32_0 = arith.constant 0 : i32
    return %arg0, %c0_i32 : i32, i32
  }
  func.func @transform_1(%arg0: i32) -> (i32, i32) {
    %c0_i32 = arith.constant 0 : i32
    %c0_i32_0 = arith.constant 0 : i32
    %c0_i32_1 = arith.constant 0 : i32
    return %c0_i32, %c0_i32_0 : i32, i32
  }
  func.func @transform_2(%arg0: i32) -> (i32, i32) {
    %c0_i32 = arith.constant 0 : i32
    %c0_i32_0 = arith.constant 0 : i32
    %c0_i32_1 = arith.constant 0 : i32
    return %c0_i32, %c0_i32_0 : i32, i32
  }
  func.func @transform_3(%arg0: i32) -> (i32, i32) {
    %c0_i32 = arith.constant 0 : i32
    %c0_i32_0 = arith.constant 0 : i32
    %c0_i32_1 = arith.constant 0 : i32
    return %c0_i32, %c0_i32_0 : i32, i32
  }
  func.func @transform_4(%arg0: i32) -> (i32, i32) {
    %c0_i32 = arith.constant 0 : i32
    %c0_i32_0 = arith.constant 0 : i32
    %c0_i32_1 = arith.constant 0 : i32
    return %c0_i32, %c0_i32_0 : i32, i32
  }
  func.func @transform_5(%arg0: i32) -> (i32, i32) {
    %c0_i32 = arith.constant 0 : i32
    %c0_i32_0 = arith.constant 0 : i32
    %c0_i32_1 = arith.constant 0 : i32
    return %c0_i32, %c0_i32_0 : i32, i32
  }
  func.func @transform_6(%arg0: i32) -> (i32, i32) {
    %c0_i32 = arith.constant 0 : i32
    %c0_i32_0 = arith.constant 0 : i32
    %c0_i32_1 = arith.constant 0 : i32
    return %c0_i32, %c0_i32_0 : i32, i32
  }
  func.func @transform_7(%arg0: i32) -> (i32, i32) {
    %c0_i32 = arith.constant 0 : i32
    %c0_i32_0 = arith.constant 0 : i32
    %c0_i32_1 = arith.constant 0 : i32
    return %c0_i32, %c0_i32_0 : i32, i32
  }
  func.func @transform_8(%arg0: i32) -> (i32, i32) {
    %c0_i32 = arith.constant 0 : i32
    %c0_i32_0 = arith.constant 0 : i32
    return %arg0, %c0_i32 : i32, i32
  }
  func.func @transform_9(%arg0: i32) -> (i32, i32) {
    %c0_i32 = arith.constant 0 : i32
    %c0_i32_0 = arith.constant 0 : i32
    return %arg0, %c0_i32 : i32, i32
  }
  func.func @transform_10(%arg0: i32) -> (i32, i32) {
    %c0_i32 = arith.constant 0 : i32
    %c0_i32_0 = arith.constant 0 : i32
    return %arg0, %c0_i32 : i32, i32
  }
}

</mosaic_0001>

<bundles_post_ra>
// kernel: tpu_custom_call.1
= control target key start
LH: loop header
LB: loop body
LE: loop exit
PB: predicated region body
PF: predicated region fallthrough
CT: control target
= control target key end

     0   :  { %v2028_v0 = vmov 0.0   ;;  %vm2029_vm0 = vmmov 0   ;;  %vm68_vm1 = vcmask 130048   ;;  %vm116_vm2 = vcmask 125952   ;;  %s2811_s1 = inlined_call_operand.vmem [shape: bf16[16,32], index: 1, kind: input, shape index: {}]   ;;  %s2812_s0 = inlined_call_operand.vmem [shape: bf16[16,16], index: 0, kind: input, shape index: {}]   ;;  %s2813_s5 = inlined_call_operand.vmem [shape: bf16[48,32], index: 5, kind: input, shape index: {}]   ;;  %s2814_s2 = inlined_call_operand.vmem [shape: f32[1,32], index: 2, kind: input, shape index: {}]   ;;  %s2815_s6 = inlined_call_operand.vmem [shape: bf16[32,16], index: 6, kind: input, shape index: {}]   ;;  %s2816_s3 = inlined_call_operand.vmem [shape: f32[1,32], index: 3, kind: input, shape index: {}]   ;;  %s2817_s7 = inlined_call_operand.vmem [shape: f32[1,16], index: 7, kind: input, shape index: {}]   ;;  %s2818_s8 = inlined_call_operand.vmem [shape: s32[16,8], index: 8, kind: output, shape index: {0}]   ;;  %s2819_s4 = inlined_call_operand.vmem [shape: f32[1,32], index: 4, kind: input, shape index: {}]   ;;  %s2820_s9 = inlined_call_operand.vmem [shape: f32[16,8], index: 9, kind: output, shape index: {1}]   ;;  %s2821_s10 = inlined_call_operand.vmem [shape: f32[16,8], index: 10, kind: output, shape index: {2}]  }
   0x1   :  { %1763 = vmatprep.subr.bf16.mxu0 %v2028_v0  ;;  %v1899_v1 = vld [vmem:[%s2811_s1] sm:$0xff]   ;;  %1765 = vmatprep.mubr.msk.bf16.mxu0 %vm2029_vm0, %v2028_v0  ;;  %v2030_v3 = vmov 0   ;;  %v2110_v4 = vld [vmem:[%s2813_s5 + $0x10] sm:$0xff]   ;;  %v2117_v5 = vld [vmem:[%s2813_s5 + $0x8] sm:$0xff]   ;;  %vm130_vm3 = vcmask 388224   ;;  %vm164_vm4 = vcmask 392192   ;;  %v114_v42 = vlaneseq }
   0x2   :  { %v1900_v2 = vld [vmem:[%s2812_s0] sm:$0xff]   ;;  %1769 = vmatprep.subr.bf16.mxu1 %v2028_v0  ;;  %1775 = vmatprep.mubr.msk.bf16.mxu1 %vm2029_vm0, %v2028_v0  ;;  %117 = vst.msk [vmem:[#allocation2] sm:$0xf] %vm116_vm2, %v2030_v3  ;;  %118 = vst.msk [vmem:[#allocation2 + $0x4] sm:$0xf] %vm116_vm2, %v2030_v3  ;;  %v2141_v21 = vld [vmem:[%s2815_s6 + $0x8] sm:$0xff]  }
   0x3   :  { %1764 = vmatpush3.bf16.msra.mxu0 %v1899_v1  ;;  %1770 = vmatpush3.bf16.msra.mxu1 %v2110_v4  ;;  %v1615_v6 = vld [vmem:[%s2814_s2] ss:$0 sm:$0xff]  ;;  %s2031_s2 = smov 16   ;;  %vm230_vm5 = vcmask 261120   ;;  %v2183_v43 = vand.u32 127, %v114_v42  ;;  %vm331_vm10 = vcmask 7168  }
   0x4   :  { %1779 = vmatprep.subr.bf16.mxu0 %v2028_v0  ;;  %1771 = vmatprep.subr.bf16.mxu1 %v2028_v0  ;;  %v2127_v9 = vld [vmem:[%s2813_s5] sm:$0xff]  }
   0x5   :  { %v2147_v22 = vld [vmem:[%s2815_s6] sm:$0xff]  }
   0x6   :  { %1766 = vmatmul.mubr.msk.bf16.vlgmr.msra.gmra.mxu0 %vm68_vm1, %v1900_v2  ;;  %v1621_v23 = vld [vmem:[%s2816_s3] ss:$0 sm:$0xff] }
   0x7   :  { %1783 = vmatprep.mubr.msk.bf16.mxu0 %vm2029_vm0, %v2028_v0  ;;  %1772 = vmatpush3.bf16.msra.mxu1 %v2117_v5  ;;  %v2171_v33 = vld [vmem:[%s2817_s7] ss:$0 sm:$0xff] }
   0x8   :  { %1773 = vmatprep.subr.bf16.mxu1 %v2028_v0  ;;  %1780 = vmatpush3.bf16.msra.mxu0 %v2141_v21 }
   0x9   :  { %1781 = vmatprep.subr.bf16.mxu0 %v2028_v0 }
   0xb   :  { %1774 = vmatpush3.bf16.msra.mxu1 %v2127_v9 }
   0xc   :  { %1797 = vmatprep.subr.bf16.mxu1 %v2028_v0  ;;  %1782 = vmatpush3.bf16.msra.mxu0 %v2147_v22 }
   0xd   :  { %1787 = vmatprep.subr.bf16.mxu0 %v2028_v0 }
  0xc6   :  { %v106_v7 = vpop.f32.mrf.mxu0 }
  0xc7   :  { %v107_v8 = vadd.f32 %v1615_v6, %v106_v7 }
  0xc8   :  { %v1767_v10 = vpop.f32.mrf.mxu0 }
  0xc9   :  { %v1686_v11 = vpack.c.bf16 %v107_v8, %v107_v8 }
  0xca   :  { %v109_v12 = vpop.f32.mrf.mxu0 }
  0xcb   :  { %v110_v13 = vadd.f32 %v1615_v6, %v109_v12  ;;  %124 = vrot.lane.b32.xlu0 %v1686_v11, %s2031_s2 }
  0xcc   :  { %v1768_v14 = vpop.f32.mrf.mxu0 }
  0xcd   :  { %v1687_v15 = vpack.c.bf16 %v110_v13, %v110_v13 }
  0xcf   :  { %126 = vrot.lane.b32.xlu0 %v1687_v15, %s2031_s2 }
 0x13d   :  { %v125_v16 = vpop.permute.xlu0 %124 }
 0x13e   :  { %131 = vst.msk [vmem:[#allocation2] sm:$0xf] %vm130_vm3, %v125_v16 }
 0x141   :  { %v127_v17 = vpop.permute.xlu0 %126 }
 0x142   :  { %132 = vst.msk [vmem:[#allocation2 + $0x4] sm:$0xf] %vm130_vm3, %v127_v17 }
 0x145   :  { %v133_v18 = vld [vmem:[#allocation2] sm:$0xf] }
 0x149   :  { %v134_v19 = vld [vmem:[#allocation2 + $0x4] sm:$0xf] }
 0x14a   :  { %v1622_v20 = vcombine.low %v133_v18, %v134_v19 }
 0x14c   :  { %1776 = vmatmul.mubr.msk.bf16.vlgmr.msra.gmra.mxu1 %vm164_vm4, %v1622_v20 }
 0x14d   :  { %1801 = vmatprep.mubr.msk.bf16.mxu1 %vm2029_vm0, %v2028_v0  ;;  %1798 = vmatpush3.bf16.msra.mxu1 %v2141_v21 }
 0x14e   :  { %1799 = vmatprep.subr.bf16.mxu1 %v2028_v0 }
 0x151   :  { %1800 = vmatpush3.bf16.msra.mxu1 %v2147_v22 }
 0x152   :  { %1805 = vmatprep.subr.bf16.mxu1 %v2028_v0 }
 0x20c   :  { %v202_v24 = vpop.f32.mrf.mxu1 }
 0x20d   :  { %v203_v25 = vadd.f32 %v1621_v23, %v202_v24  ;;  %v2225_v24 = vld [vmem:[%s2819_s4] ss:$0 sm:$0xff] }
 0x20e   :  { %v1777_v26 = vpop.f32.mrf.mxu1 }
 0x20f   :  { %1912 = vtanh.f32 %v203_v25 }
 0x210   :  { %v205_v27 = vpop.f32.mrf.mxu1 }
 0x211   :  { %v206_v28 = vadd.f32 %v1621_v23, %v205_v27 }
 0x212   :  { %v1778_v29 = vpop.f32.mrf.mxu1 }
 0x213   :  { %1914 = vtanh.f32 %v206_v28 }
 0x21c   :  { %v1913_v30 = vpop.eup %1912 }
 0x21d   :  { %v1690_v54 = vpack.c.bf16 %v1913_v30, %v1913_v30 }
 0x220   :  { %v1915_v31 = vpop.eup %1914 }
 0x221   :  { %v211_v32 = vpack.c.bf16 %v1915_v31, %v1913_v30  ;;  %v1691_v63 = vpack.c.bf16 %v1915_v31, %v1915_v31 }
 0x223   :  { %1784 = vmatmul.mubr.msk.bf16.vlgmr.msra.gmra.mxu0 %vm230_vm5, %v211_v32 }
 0x224   :  { %1788 = vmatpush3.bf16.msra.mxu0 %v2110_v4  ;;  %1793 = vmatprep.mubr.msk.bf16.mxu0 %vm2029_vm0, %v2028_v0 }
 0x225   :  { %1789 = vmatprep.subr.bf16.mxu0 %v2028_v0 }
 0x228   :  { %1790 = vmatpush3.bf16.msra.mxu0 %v2117_v5 }
 0x229   :  { %1791 = vmatprep.subr.bf16.mxu0 %v2028_v0 }
 0x22c   :  { %1792 = vmatpush3.bf16.msra.mxu0 %v2127_v9 }
 0x22d   :  { %1815 = vmatprep.subr.bf16.mxu0 %v2028_v0 }
 0x2e3   :  { %v268_v34 = vpop.f32.mrf.mxu0 }
 0x2e4   :  { %v2174_v35 = vadd.f32 %v2171_v33, %v268_v34 }
 0x2e5   :  { %v1785_v36 = vpop.f32.mrf.mxu0 }
 0x2e6   :  { %v275_v37 = vsel %vm68_vm1, %v2174_v35, -inf }
 0x2e7   :  { %276 = vmax.xlane.f32.xlu1 %v275_v37  ;;  %v271_v38 = vpop.f32.mrf.mxu0 }
 0x2e8   :  { %v2179_v39 = vadd.f32 %v2171_v33, %v271_v38 }
 0x2e9   :  { %v1786_v40 = vpop.f32.mrf.mxu0 }
 0x2ea   :  { %v278_v41 = vsel %vm68_vm1, %v2179_v39, -inf }
 0x2eb   :  { %279 = vmax.xlane.f32.xlu1 %v278_v41 }
 0x370   :  { %v2185_v44 = vpop.xlane.xlu1 %276 }
 0x371   :  { %vm297_vm6 = vcmp.eq.f32.partialorder %v2174_v35, %v2185_v44 }
 0x372   :  { %v299_v45 = vsel %vm297_vm6, %v2183_v43, 16 }
 0x373   :  { %v301_v46 = vsel %vm68_vm1, %v299_v45, 2147483647 }
 0x374   :  { %v2191_v47 = vpop.xlane.xlu1 %279  ;;  %v303_v48 = vshra.s32 %v301_v46, 16  ;;  %v302_v55 = vand.u32 65535, %v301_v46 }
 0x375   :  { %vm298_vm7 = vcmp.eq.f32.partialorder %v2179_v39, %v2191_v47 }
 0x376   :  { %v300_v49 = vsel %vm298_vm7, %v2183_v43, 16  ;;  %v305_v50 = vcvt.s32.f32 %v303_v48  ;;  %v304_v57 = vcvt.s32.f32 %v302_v55  ;;  %vm543_vm7 = vcmask 15368  }
 0x377   :  { %v316_v51 = vsel %vm68_vm1, %v300_v49, 2147483647 }
 0x378   :  { %306 = vmin.xlane.f32.xlu0 %v305_v50  ;;  %v318_v52 = vshra.s32 %v316_v51, 16  ;;  %v317_v58 = vand.u32 65535, %v316_v51 }
 0x37a   :  { %v320_v53 = vcvt.s32.f32 %v318_v52  ;;  %v319_v61 = vcvt.s32.f32 %v317_v58 }
 0x37c   :  { %321 = vmin.xlane.f32.xlu1 %v320_v53 }
 0x38d   :  { %375 = vrot.lane.b32.xlu1 %v1690_v54, %s2031_s2 }
 0x401   :  { %v307_v56 = vpop.xlane.xlu0 %306 }
 0x402   :  { %vm308_vm8 = vcmp.eq.f32.partialorder %v305_v50, %v307_v56  ;;  %v313_v2 = vcvt.f32.s32 %v307_v56 }
 0x403   :  { %v309_v59 = vsel %vm308_vm8, %v304_v57, inf }
 0x404   :  { %310 = vmin.xlane.f32.xlu1 %v309_v59  ;;  %v314_v7 = vshll.u32 %v313_v2, 16 }
 0x405   :  { %v322_v60 = vpop.xlane.xlu1 %321 }
 0x406   :  { %vm323_vm9 = vcmp.eq.f32.partialorder %v320_v53, %v322_v60  ;;  %v328_v8 = vcvt.f32.s32 %v322_v60 }
 0x407   :  { %v324_v62 = vsel %vm323_vm9, %v319_v61, inf }
 0x408   :  { %325 = vmin.xlane.f32.xlu1 %v324_v62  ;;  %v329_v13 = vshll.u32 %v328_v8, 16 }
 0x409   :  { %v376_v1 = vpop.permute.xlu1 %375 }
 0x419   :  { %377 = vrot.lane.b32.xlu1 %v1691_v63, %s2031_s2 }
 0x48d   :  { %v311_v6 = vpop.xlane.xlu1 %310 }
 0x48e   :  { %v312_v10 = vcvt.f32.s32 %v311_v6 }
 0x490   :  { %v315_v11 = vadd.s32 %v314_v7, %v312_v10 }
 0x491   :  { %v326_v12 = vpop.xlane.xlu1 %325 }
 0x492   :  { %332 = vst.msk [vmem:[%s2818_s8] sm:$0xff] %vm331_vm10, %v315_v11  ;;  %vm354_vm11 = vcmp.eq.s32.totalorder %v2183_v43, %v315_v11  ;;  %v327_v14 = vcvt.f32.s32 %v326_v12 }
 0x493   :  { %v1631_v15 = vsel %vm354_vm11, 1.0, %v2028_v0 }
 0x494   :  { %v1688_v16 = vpack.c.bf16 %v1631_v15, %v1631_v15  ;;  %v330_v17 = vadd.s32 %v329_v13, %v327_v14 }
 0x495   :  { %v378_v20 = vpop.permute.xlu1 %377 }
 0x496   :  { %368 = vst.msk [vmem:[#allocation2] sm:$0xf] %vm116_vm2, %v1688_v16  ;;  %vm355_vm12 = vcmp.eq.s32.totalorder %v2183_v43, %v330_v17 }
 0x497   :  { %333 = vst.msk [vmem:[%s2818_s8 + $0x8] sm:$0xff] %vm331_vm10, %v330_v17  ;;  %v1632_v18 = vsel %vm355_vm12, 1.0, %v2028_v0 }
 0x498   :  { %381 = vst.msk [vmem:[#allocation2] sm:$0xf] %vm130_vm3, %v376_v1  ;;  %v1689_v19 = vpack.c.bf16 %v1632_v18, %v1632_v18 }
 0x49a   :  { %369 = vst.msk [vmem:[#allocation2 + $0x4] sm:$0xf] %vm116_vm2, %v1689_v19 }
 0x49b   :  { %382 = vst.msk [vmem:[#allocation2 + $0x4] sm:$0xf] %vm130_vm3, %v378_v20 }
 0x4a2   :  { %v1906_v23 = vld [vmem:[#allocation2] sm:$0xff]  }
 0x4a3   :  { %1794 = vmatmul.mubr.msk.bf16.vlgmr.msra.gmra.mxu0 %vm164_vm4, %v1906_v23 }
 0x4a4   :  { %1816 = vmatpush3.bf16.msra.mxu0 %v2141_v21  ;;  %1819 = vmatprep.mubr.msk.bf16.mxu0 %vm2029_vm0, %v2028_v0 }
 0x4a5   :  { %1817 = vmatprep.subr.bf16.mxu0 %v2028_v0 }
 0x4a8   :  { %1818 = vmatpush3.bf16.msra.mxu0 %v2147_v22 }
 0x4a9   :  { %1823 = vmatprep.subr.bf16.mxu0 %v2028_v0 }
 0x563   :  { %v433_v25 = vpop.f32.mrf.mxu0 }
 0x564   :  { %v434_v26 = vadd.f32 %v2225_v24, %v433_v25 }
 0x565   :  { %v1795_v27 = vpop.f32.mrf.mxu0 }
 0x566   :  { %1916 = vtanh.f32 %v434_v26 }
 0x567   :  { %v436_v28 = vpop.f32.mrf.mxu0 }
 0x568   :  { %v437_v29 = vadd.f32 %v2225_v24, %v436_v28 }
 0x569   :  { %v1796_v30 = vpop.f32.mrf.mxu0 }
 0x56a   :  { %1918 = vtanh.f32 %v437_v29 }
 0x573   :  { %v1917_v31 = vpop.eup %1916 }
 0x574   :  { %v1694_v7 = vpack.c.bf16 %v1917_v31, %v1917_v31 }
 0x577   :  { %v1919_v32 = vpop.eup %1918 }
 0x578   :  { %v442_v34 = vpack.c.bf16 %v1919_v32, %v1917_v31  ;;  %v1695_v48 = vpack.c.bf16 %v1919_v32, %v1919_v32 }
 0x57a   :  { %1802 = vmatmul.mubr.msk.bf16.vlgmr.msra.gmra.mxu1 %vm230_vm5, %v442_v34 }
 0x57b   :  { %1806 = vmatpush3.bf16.msra.mxu1 %v2110_v4  ;;  %1811 = vmatprep.mubr.msk.bf16.mxu1 %vm2029_vm0, %v2028_v0 }
 0x57c   :  { %1807 = vmatprep.subr.bf16.mxu1 %v2028_v0 }
 0x57f   :  { %1808 = vmatpush3.bf16.msra.mxu1 %v2117_v5 }
 0x580   :  { %1809 = vmatprep.subr.bf16.mxu1 %v2028_v0 }
 0x583   :  { %1810 = vmatpush3.bf16.msra.mxu1 %v2127_v9 }
 0x584   :  { %1833 = vmatprep.subr.bf16.mxu1 %v2028_v0 }
 0x63a   :  { %v480_v36 = vpop.f32.mrf.mxu1 }
 0x63b   :  { %v2239_v37 = vadd.f32 %v2171_v33, %v480_v36 }
 0x63c   :  { %v1803_v38 = vpop.f32.mrf.mxu1 }
 0x63d   :  { %v487_v40 = vsel %vm68_vm1, %v2239_v37, -inf }
 0x63e   :  { %488 = vmax.xlane.f32.xlu0 %v487_v40  ;;  %v483_v41 = vpop.f32.mrf.mxu1 }
 0x63f   :  { %v2244_v42 = vadd.f32 %v2171_v33, %v483_v41 }
 0x640   :  { %v1804_v45 = vpop.f32.mrf.mxu1 }
 0x641   :  { %v490_v46 = vsel %vm68_vm1, %v2244_v42, -inf }
 0x642   :  { %491 = vmax.xlane.f32.xlu1 %v490_v46 }
 0x653   :  { %589 = vrot.lane.b32.xlu1 %v1695_v48, %s2031_s2 }
 0x6c7   :  { %v2249_v49 = vpop.xlane.xlu0 %488 }
 0x6c8   :  { %vm509_vm13 = vcmp.eq.f32.partialorder %v2239_v37, %v2249_v49 }
 0x6c9   :  { %v511_v50 = vsel %vm509_vm13, %v2183_v43, 16 }
 0x6ca   :  { %v513_v51 = vsel %vm68_vm1, %v511_v50, 2147483647 }
 0x6cb   :  { %v2255_v52 = vpop.xlane.xlu1 %491  ;;  %v515_v53 = vshra.s32 %v513_v51, 16  ;;  %v514_v59 = vand.u32 65535, %v513_v51 }
 0x6cc   :  { %vm510_vm14 = vcmp.eq.f32.partialorder %v2244_v42, %v2255_v52 }
 0x6cd   :  { %v512_v54 = vsel %vm510_vm14, %v2183_v43, 16  ;;  %v517_v55 = vcvt.s32.f32 %v515_v53  ;;  %v516_v61 = vcvt.s32.f32 %v514_v59 }
 0x6ce   :  { %v528_v56 = vsel %vm68_vm1, %v512_v54, 2147483647 }
 0x6cf   :  { %518 = vmin.xlane.f32.xlu0 %v517_v55  ;;  %v530_v57 = vshra.s32 %v528_v56, 16  ;;  %v529_v62 = vand.u32 65535, %v528_v56  ;;  %v590_v27 = vpop.permute.xlu1 %589 }
 0x6d1   :  { %v532_v58 = vcvt.s32.f32 %v530_v57  ;;  %v531_v2 = vcvt.s32.f32 %v529_v62 }
 0x6d3   :  { %533 = vmin.xlane.f32.xlu0 %v532_v58 }
 0x758   :  { %v519_v60 = vpop.xlane.xlu0 %518 }
 0x759   :  { %vm520_vm15 = vcmp.eq.f32.partialorder %v517_v55, %v519_v60  ;;  %v525_v8 = vcvt.f32.s32 %v519_v60 }
 0x75a   :  { %v521_v63 = vsel %vm520_vm15, %v516_v61, inf  ;;  %vm749_vm15 = vcmask 23568  }
 0x75b   :  { %522 = vmin.xlane.f32.xlu0 %v521_v63  ;;  %v526_v11 = vshll.u32 %v525_v8, 16 }
 0x75c   :  { %v534_v1 = vpop.xlane.xlu0 %533 }
 0x75d   :  { %vm535_vm6 = vcmp.eq.f32.partialorder %v532_v58, %v534_v1  ;;  %v540_v12 = vcvt.f32.s32 %v534_v1 }
 0x75e   :  { %v536_v6 = vsel %vm535_vm6, %v531_v2, inf }
 0x75f   :  { %537 = vmin.xlane.f32.xlu0 %v536_v6  ;;  %v541_v16 = vshll.u32 %v540_v12, 16 }
 0x775   :  { %587 = vrot.lane.b32.xlu0 %v1694_v7, %s2031_s2 }
 0x7e4   :  { %v523_v10 = vpop.xlane.xlu0 %522 }
 0x7e5   :  { %v524_v13 = vcvt.f32.s32 %v523_v10 }
 0x7e7   :  { %v527_v14 = vadd.s32 %v526_v11, %v524_v13 }
 0x7e8   :  { %v538_v15 = vpop.xlane.xlu0 %537 }
 0x7e9   :  { %544 = vst.msk [vmem:[%s2818_s8] sm:$0xff] %vm543_vm7, %v527_v14  ;;  %vm566_vm8 = vcmp.eq.s32.totalorder %v2183_v43, %v527_v14  ;;  %v539_v17 = vcvt.f32.s32 %v538_v15 }
 0x7ea   :  { %v1641_v18 = vsel %vm566_vm8, 1.0, %v2028_v0 }
 0x7eb   :  { %v1692_v19 = vpack.c.bf16 %v1641_v18, %v1641_v18  ;;  %v542_v20 = vadd.s32 %v541_v16, %v539_v17 }
 0x7ec   :  { %v588_v23 = vpop.permute.xlu0 %587 }
 0x7ed   :  { %580 = vst.msk [vmem:[#allocation2] sm:$0xf] %vm116_vm2, %v1692_v19  ;;  %vm567_vm9 = vcmp.eq.s32.totalorder %v2183_v43, %v542_v20 }
 0x7ee   :  { %545 = vst.msk [vmem:[%s2818_s8 + $0x8] sm:$0xff] %vm543_vm7, %v542_v20  ;;  %v1642_v25 = vsel %vm567_vm9, 1.0, %v2028_v0 }
 0x7ef   :  { %593 = vst.msk [vmem:[#allocation2] sm:$0xf] %vm130_vm3, %v588_v23  ;;  %v1693_v26 = vpack.c.bf16 %v1642_v25, %v1642_v25 }
 0x7f1   :  { %581 = vst.msk [vmem:[#allocation2 + $0x4] sm:$0xf] %vm116_vm2, %v1693_v26 }
 0x7f2   :  { %594 = vst.msk [vmem:[#allocation2 + $0x4] sm:$0xf] %vm130_vm3, %v590_v27 }
 0x7f9   :  { %v1907_v28 = vld [vmem:[#allocation2] sm:$0xff]  }
 0x7fa   :  { %1812 = vmatmul.mubr.msk.bf16.vlgmr.msra.gmra.mxu1 %vm164_vm4, %v1907_v28 }
 0x7fb   :  { %1834 = vmatpush3.bf16.msra.mxu1 %v2141_v21  ;;  %1837 = vmatprep.mubr.msk.bf16.mxu1 %vm2029_vm0, %v2028_v0 }
 0x7fc   :  { %1835 = vmatprep.subr.bf16.mxu1 %v2028_v0 }
 0x7ff   :  { %1836 = vmatpush3.bf16.msra.mxu1 %v2147_v22 }
 0x800   :  { %1841 = vmatprep.subr.bf16.mxu1 %v2028_v0 }
 0x8ba   :  { %v639_v29 = vpop.f32.mrf.mxu1 }
 0x8bb   :  { %v640_v30 = vadd.f32 %v2225_v24, %v639_v29 }
 0x8bc   :  { %v1813_v31 = vpop.f32.mrf.mxu1 }
 0x8bd   :  { %1920 = vtanh.f32 %v640_v30 }
 0x8be   :  { %v642_v32 = vpop.f32.mrf.mxu1 }
 0x8bf   :  { %v643_v34 = vadd.f32 %v2225_v24, %v642_v32 }
 0x8c0   :  { %v1814_v36 = vpop.f32.mrf.mxu1 }
 0x8c1   :  { %1922 = vtanh.f32 %v643_v34 }
 0x8ca   :  { %v1921_v38 = vpop.eup %1920 }
 0x8cb   :  { %v1698_v16 = vpack.c.bf16 %v1921_v38, %v1921_v38 }
 0x8ce   :  { %v1923_v40 = vpop.eup %1922 }
 0x8cf   :  { %v648_v41 = vpack.c.bf16 %v1923_v40, %v1921_v38  ;;  %v1699_v56 = vpack.c.bf16 %v1923_v40, %v1923_v40 }
 0x8d1   :  { %1820 = vmatmul.mubr.msk.bf16.vlgmr.msra.gmra.mxu0 %vm230_vm5, %v648_v41 }
 0x8d2   :  { %1824 = vmatpush3.bf16.msra.mxu0 %v2110_v4  ;;  %1829 = vmatprep.mubr.msk.bf16.mxu0 %vm2029_vm0, %v2028_v0 }
 0x8d3   :  { %1825 = vmatprep.subr.bf16.mxu0 %v2028_v0 }
 0x8d6   :  { %1826 = vmatpush3.bf16.msra.mxu0 %v2117_v5 }
 0x8d7   :  { %1827 = vmatprep.subr.bf16.mxu0 %v2028_v0 }
 0x8da   :  { %1828 = vmatpush3.bf16.msra.mxu0 %v2127_v9 }
 0x8db   :  { %1851 = vmatprep.subr.bf16.mxu0 %v2028_v0 }
 0x991   :  { %v686_v45 = vpop.f32.mrf.mxu0 }
 0x992   :  { %v2297_v46 = vadd.f32 %v2171_v33, %v686_v45 }
 0x993   :  { %v1821_v48 = vpop.f32.mrf.mxu0 }
 0x994   :  { %v693_v50 = vsel %vm68_vm1, %v2297_v46, -inf }
 0x995   :  { %694 = vmax.xlane.f32.xlu0 %v693_v50  ;;  %v689_v51 = vpop.f32.mrf.mxu0 }
 0x996   :  { %v2302_v53 = vadd.f32 %v2171_v33, %v689_v51 }
 0x997   :  { %v1822_v54 = vpop.f32.mrf.mxu0 }
 0x998   :  { %v696_v55 = vsel %vm68_vm1, %v2302_v53, -inf }
 0x999   :  { %697 = vmax.xlane.f32.xlu1 %v696_v55 }
 0x9aa   :  { %795 = vrot.lane.b32.xlu1 %v1699_v56, %s2031_s2 }
 0xa1e   :  { %v2307_v57 = vpop.xlane.xlu0 %694 }
 0xa1f   :  { %vm715_vm11 = vcmp.eq.f32.partialorder %v2297_v46, %v2307_v57 }
 0xa20   :  { %v717_v58 = vsel %vm715_vm11, %v2183_v43, 16 }
 0xa21   :  { %v719_v59 = vsel %vm68_vm1, %v717_v58, 2147483647 }
 0xa22   :  { %v2313_v60 = vpop.xlane.xlu1 %697  ;;  %v721_v61 = vshra.s32 %v719_v59, 16  ;;  %v720_v7 = vand.u32 65535, %v719_v59 }
 0xa23   :  { %vm716_vm12 = vcmp.eq.f32.partialorder %v2302_v53, %v2313_v60 }
 0xa24   :  { %v718_v62 = vsel %vm716_vm12, %v2183_v43, 16  ;;  %v723_v63 = vcvt.s32.f32 %v721_v61  ;;  %v722_v10 = vcvt.s32.f32 %v720_v7 }
 0xa25   :  { %v734_v1 = vsel %vm68_vm1, %v718_v62, 2147483647 }
 0xa26   :  { %724 = vmin.xlane.f32.xlu0 %v723_v63  ;;  %v736_v2 = vshra.s32 %v734_v1, 16  ;;  %v735_v11 = vand.u32 65535, %v734_v1  ;;  %v796_v38 = vpop.permute.xlu1 %795 }
 0xa28   :  { %v738_v6 = vcvt.s32.f32 %v736_v2  ;;  %v737_v14 = vcvt.s32.f32 %v735_v11 }
 0xa2a   :  { %739 = vmin.xlane.f32.xlu0 %v738_v6 }
 0xaaf   :  { %v725_v8 = vpop.xlane.xlu0 %724 }
 0xab0   :  { %vm726_vm13 = vcmp.eq.f32.partialorder %v723_v63, %v725_v8  ;;  %v731_v17 = vcvt.f32.s32 %v725_v8 }
 0xab1   :  { %v727_v12 = vsel %vm726_vm13, %v722_v10, inf }
 0xab2   :  { %728 = vmin.xlane.f32.xlu0 %v727_v12  ;;  %v732_v19 = vshll.u32 %v731_v17, 16 }
 0xab3   :  { %v740_v13 = vpop.xlane.xlu0 %739 }
 0xab4   :  { %vm741_vm14 = vcmp.eq.f32.partialorder %v738_v6, %v740_v13  ;;  %v746_v20 = vcvt.f32.s32 %v740_v13 }
 0xab5   :  { %v742_v15 = vsel %vm741_vm14, %v737_v14, inf  ;;  %vm955_vm14 = vcmask 31768  }
 0xab6   :  { %743 = vmin.xlane.f32.xlu0 %v742_v15  ;;  %v747_v27 = vshll.u32 %v746_v20, 16 }
 0xacc   :  { %793 = vrot.lane.b32.xlu0 %v1698_v16, %s2031_s2 }
 0xb3b   :  { %v729_v18 = vpop.xlane.xlu0 %728 }
 0xb3c   :  { %v730_v23 = vcvt.f32.s32 %v729_v18 }
 0xb3e   :  { %v733_v25 = vadd.s32 %v732_v19, %v730_v23 }
 0xb3f   :  { %v744_v26 = vpop.xlane.xlu0 %743 }
 0xb40   :  { %750 = vst.msk [vmem:[%s2818_s8] sm:$0xff] %vm749_vm15, %v733_v25  ;;  %vm772_vm6 = vcmp.eq.s32.totalorder %v2183_v43, %v733_v25  ;;  %v745_v28 = vcvt.f32.s32 %v744_v26 }
 0xb41   :  { %v1650_v29 = vsel %vm772_vm6, 1.0, %v2028_v0 }
 0xb42   :  { %v1696_v30 = vpack.c.bf16 %v1650_v29, %v1650_v29  ;;  %v748_v31 = vadd.s32 %v747_v27, %v745_v28 }
 0xb43   :  { %v794_v32 = vpop.permute.xlu0 %793 }
 0xb44   :  { %786 = vst.msk [vmem:[#allocation2] sm:$0xf] %vm116_vm2, %v1696_v30  ;;  %vm773_vm8 = vcmp.eq.s32.totalorder %v2183_v43, %v748_v31 }
 0xb45   :  { %751 = vst.msk [vmem:[%s2818_s8 + $0x8] sm:$0xff] %vm749_vm15, %v748_v31  ;;  %v1651_v34 = vsel %vm773_vm8, 1.0, %v2028_v0 }
 0xb46   :  { %799 = vst.msk [vmem:[#allocation2] sm:$0xf] %vm130_vm3, %v794_v32  ;;  %v1697_v36 = vpack.c.bf16 %v1651_v34, %v1651_v34 }
 0xb48   :  { %787 = vst.msk [vmem:[#allocation2 + $0x4] sm:$0xf] %vm116_vm2, %v1697_v36 }
 0xb49   :  { %800 = vst.msk [vmem:[#allocation2 + $0x4] sm:$0xf] %vm130_vm3, %v796_v38 }
 0xb50   :  { %v1908_v40 = vld [vmem:[#allocation2] sm:$0xff]  }
 0xb51   :  { %1830 = vmatmul.mubr.msk.bf16.vlgmr.msra.gmra.mxu0 %vm164_vm4, %v1908_v40 }
 0xb52   :  { %1852 = vmatpush3.bf16.msra.mxu0 %v2141_v21  ;;  %1855 = vmatprep.mubr.msk.bf16.mxu0 %vm2029_vm0, %v2028_v0 }
 0xb53   :  { %1853 = vmatprep.subr.bf16.mxu0 %v2028_v0 }
 0xb56   :  { %1854 = vmatpush3.bf16.msra.mxu0 %v2147_v22 }
 0xb57   :  { %1859 = vmatprep.subr.bf16.mxu0 %v2028_v0 }
 0xc11   :  { %v845_v41 = vpop.f32.mrf.mxu0 }
 0xc12   :  { %v846_v45 = vadd.f32 %v2225_v24, %v845_v41 }
 0xc13   :  { %v1831_v48 = vpop.f32.mrf.mxu0 }
 0xc14   :  { %1924 = vtanh.f32 %v846_v45 }
 0xc15   :  { %v848_v50 = vpop.f32.mrf.mxu0 }
 0xc16   :  { %v849_v51 = vadd.f32 %v2225_v24, %v848_v50 }
 0xc17   :  { %v1832_v54 = vpop.f32.mrf.mxu0 }
 0xc18   :  { %1926 = vtanh.f32 %v849_v51 }
 0xc21   :  { %v1925_v55 = vpop.eup %1924 }
 0xc22   :  { %v1702_v31 = vpack.c.bf16 %v1925_v55, %v1925_v55 }
 0xc25   :  { %v1927_v56 = vpop.eup %1926 }
 0xc26   :  { %v854_v58 = vpack.c.bf16 %v1927_v56, %v1925_v55  ;;  %v1703_v30 = vpack.c.bf16 %v1927_v56, %v1927_v56 }
 0xc28   :  { %1838 = vmatmul.mubr.msk.bf16.vlgmr.msra.gmra.mxu1 %vm230_vm5, %v854_v58 }
 0xc29   :  { %1842 = vmatpush3.bf16.msra.mxu1 %v2110_v4  ;;  %1847 = vmatprep.mubr.msk.bf16.mxu1 %vm2029_vm0, %v2028_v0 }
 0xc2a   :  { %1843 = vmatprep.subr.bf16.mxu1 %v2028_v0 }
 0xc2d   :  { %1844 = vmatpush3.bf16.msra.mxu1 %v2117_v5 }
 0xc2e   :  { %1845 = vmatprep.subr.bf16.mxu1 %v2028_v0 }
 0xc31   :  { %1846 = vmatpush3.bf16.msra.mxu1 %v2127_v9 }
 0xc32   :  { %1869 = vmatprep.subr.bf16.mxu1 %v2028_v0 }
 0xce8   :  { %v892_v59 = vpop.f32.mrf.mxu1 }
 0xce9   :  { %v2355_v61 = vadd.f32 %v2171_v33, %v892_v59 }
 0xcea   :  { %v1839_v62 = vpop.f32.mrf.mxu1 }
 0xceb   :  { %v899_v63 = vsel %vm68_vm1, %v2355_v61, -inf }
 0xcec   :  { %900 = vmax.xlane.f32.xlu1 %v899_v63  ;;  %v895_v1 = vpop.f32.mrf.mxu1 }
 0xced   :  { %v2360_v2 = vadd.f32 %v2171_v33, %v895_v1 }
 0xcee   :  { %v1840_v6 = vpop.f32.mrf.mxu1 }
 0xcef   :  { %v902_v7 = vsel %vm68_vm1, %v2360_v2, -inf }
 0xcf0   :  { %903 = vmax.xlane.f32.xlu0 %v902_v7 }
 0xd75   :  { %v2364_v8 = vpop.xlane.xlu1 %900 }
 0xd76   :  { %vm921_vm9 = vcmp.eq.f32.partialorder %v2355_v61, %v2364_v8 }
 0xd77   :  { %v923_v10 = vsel %vm921_vm9, %v2183_v43, 16 }
 0xd78   :  { %v925_v11 = vsel %vm68_vm1, %v923_v10, 2147483647 }
 0xd79   :  { %v2370_v12 = vpop.xlane.xlu0 %903  ;;  %v927_v13 = vshra.s32 %v925_v11, 16  ;;  %v926_v19 = vand.u32 65535, %v925_v11 }
 0xd7a   :  { %vm922_vm11 = vcmp.eq.f32.partialorder %v2360_v2, %v2370_v12 }
 0xd7b   :  { %v924_v14 = vsel %vm922_vm11, %v2183_v43, 16  ;;  %v929_v15 = vcvt.s32.f32 %v927_v13  ;;  %v928_v23 = vcvt.s32.f32 %v926_v19 }
 0xd7c   :  { %v940_v16 = vsel %vm68_vm1, %v924_v14, 2147483647 }
 0xd7d   :  { %930 = vmin.xlane.f32.xlu0 %v929_v15  ;;  %v942_v17 = vshra.s32 %v940_v16, 16  ;;  %v941_v25 = vand.u32 65535, %v940_v16 }
 0xd7f   :  { %v944_v18 = vcvt.s32.f32 %v942_v17  ;;  %v943_v28 = vcvt.s32.f32 %v941_v25 }
 0xd81   :  { %945 = vmin.xlane.f32.xlu1 %v944_v18 }
 0xe06   :  { %v931_v20 = vpop.xlane.xlu0 %930 }
 0xe07   :  { %vm932_vm12 = vcmp.eq.f32.partialorder %v929_v15, %v931_v20  ;;  %v937_v32 = vcvt.f32.s32 %v931_v20 }
 0xe08   :  { %v933_v26 = vsel %vm932_vm12, %v928_v23, inf }
 0xe09   :  { %934 = vmin.xlane.f32.xlu0 %v933_v26  ;;  %v938_v36 = vshll.u32 %v937_v32, 16 }
 0xe0a   :  { %v946_v27 = vpop.xlane.xlu1 %945 }
 0xe0b   :  { %vm947_vm13 = vcmp.eq.f32.partialorder %v944_v18, %v946_v27  ;;  %v952_v38 = vcvt.f32.s32 %v946_v27 }
 0xe0c   :  { %v948_v29 = vsel %vm947_vm13, %v943_v28, inf }
 0xe0d   :  { %949 = vmin.xlane.f32.xlu1 %v948_v29  ;;  %v953_v48 = vshll.u32 %v952_v38, 16 }
 0xe1e   :  { %1001 = vrot.lane.b32.xlu1 %v1703_v30, %s2031_s2 }
 0xe1f   :  { %999 = vrot.lane.b32.xlu0 %v1702_v31, %s2031_s2 }
 0xe92   :  { %v935_v34 = vpop.xlane.xlu0 %934 }
 0xe93   :  { %v936_v40 = vcvt.f32.s32 %v935_v34 }
 0xe95   :  { %v939_v41 = vadd.s32 %v938_v36, %v936_v40 }
 0xe96   :  { %v950_v45 = vpop.xlane.xlu1 %949  ;;  %v1000_v56 = vpop.permute.xlu0 %999 }
 0xe97   :  { %956 = vst.msk [vmem:[%s2818_s8] sm:$0xff] %vm955_vm14, %v939_v41  ;;  %vm978_vm6 = vcmp.eq.s32.totalorder %v2183_v43, %v939_v41  ;;  %v951_v50 = vcvt.f32.s32 %v950_v45 }
 0xe98   :  { %v1659_v51 = vsel %vm978_vm6, 1.0, %v2028_v0  ;;  %vm1161_vm6 = vcmask 39968  }
 0xe99   :  { %v1700_v54 = vpack.c.bf16 %v1659_v51, %v1659_v51  ;;  %v954_v55 = vadd.s32 %v953_v48, %v951_v50 }
 0xe9a   :  { %v1002_v62 = vpop.permute.xlu1 %1001 }
 0xe9b   :  { %992 = vst.msk [vmem:[#allocation2] sm:$0xf] %vm116_vm2, %v1700_v54  ;;  %vm979_vm8 = vcmp.eq.s32.totalorder %v2183_v43, %v954_v55 }
 0xe9c   :  { %957 = vst.msk [vmem:[%s2818_s8 + $0x8] sm:$0xff] %vm955_vm14, %v954_v55  ;;  %v1660_v58 = vsel %vm979_vm8, 1.0, %v2028_v0 }
 0xe9d   :  { %1005 = vst.msk [vmem:[#allocation2] sm:$0xf] %vm130_vm3, %v1000_v56  ;;  %v1701_v59 = vpack.c.bf16 %v1660_v58, %v1660_v58 }
 0xe9f   :  { %993 = vst.msk [vmem:[#allocation2 + $0x4] sm:$0xf] %vm116_vm2, %v1701_v59 }
 0xea0   :  { %1006 = vst.msk [vmem:[#allocation2 + $0x4] sm:$0xf] %vm130_vm3, %v1002_v62 }
 0xea7   :  { %v1909_v63 = vld [vmem:[#allocation2] sm:$0xff]  }
 0xea8   :  { %1848 = vmatmul.mubr.msk.bf16.vlgmr.msra.gmra.mxu1 %vm164_vm4, %v1909_v63 }
 0xea9   :  { %1870 = vmatpush3.bf16.msra.mxu1 %v2141_v21  ;;  %1873 = vmatprep.mubr.msk.bf16.mxu1 %vm2029_vm0, %v2028_v0 }
 0xeaa   :  { %1871 = vmatprep.subr.bf16.mxu1 %v2028_v0 }
 0xead   :  { %1872 = vmatpush3.bf16.msra.mxu1 %v2147_v22 }
 0xeae   :  { %1877 = vmatprep.subr.bf16.mxu1 %v2028_v0 }
 0xf68   :  { %v1051_v1 = vpop.f32.mrf.mxu1 }
 0xf69   :  { %v1052_v6 = vadd.f32 %v2225_v24, %v1051_v1 }
 0xf6a   :  { %v1849_v7 = vpop.f32.mrf.mxu1 }
 0xf6b   :  { %1928 = vtanh.f32 %v1052_v6 }
 0xf6c   :  { %v1054_v10 = vpop.f32.mrf.mxu1 }
 0xf6d   :  { %v1055_v11 = vadd.f32 %v2225_v24, %v1054_v10 }
 0xf6e   :  { %v1850_v13 = vpop.f32.mrf.mxu1 }
 0xf6f   :  { %1930 = vtanh.f32 %v1055_v11 }
 0xf78   :  { %v1929_v14 = vpop.eup %1928 }
 0xf79   :  { %v1706_v56 = vpack.c.bf16 %v1929_v14, %v1929_v14 }
 0xf7c   :  { %v1931_v15 = vpop.eup %1930 }
 0xf7d   :  { %v1060_v16 = vpack.c.bf16 %v1931_v15, %v1929_v14  ;;  %v1707_v55 = vpack.c.bf16 %v1931_v15, %v1931_v15 }
 0xf7f   :  { %1856 = vmatmul.mubr.msk.bf16.vlgmr.msra.gmra.mxu0 %vm230_vm5, %v1060_v16 }
 0xf80   :  { %1860 = vmatpush3.bf16.msra.mxu0 %v2110_v4  ;;  %1865 = vmatprep.mubr.msk.bf16.mxu0 %vm2029_vm0, %v2028_v0 }
 0xf81   :  { %1861 = vmatprep.subr.bf16.mxu0 %v2028_v0 }
 0xf84   :  { %1862 = vmatpush3.bf16.msra.mxu0 %v2117_v5 }
 0xf85   :  { %1863 = vmatprep.subr.bf16.mxu0 %v2028_v0 }
 0xf88   :  { %1864 = vmatpush3.bf16.msra.mxu0 %v2127_v9 }
 0xf89   :  { %1887 = vmatprep.subr.bf16.mxu0 %v2028_v0 }
0x103f   :  { %v1098_v17 = vpop.f32.mrf.mxu0 }
0x1040   :  { %v2413_v18 = vadd.f32 %v2171_v33, %v1098_v17 }
0x1041   :  { %v1857_v19 = vpop.f32.mrf.mxu0 }
0x1042   :  { %v1105_v4 = vsel %vm68_vm1, %v2413_v18, -inf }
0x1043   :  { %1106 = vmax.xlane.f32.xlu1 %v1105_v4  ;;  %v1101_v20 = vpop.f32.mrf.mxu0 }
0x1044   :  { %v2418_v23 = vadd.f32 %v2171_v33, %v1101_v20 }
0x1045   :  { %v1858_v5 = vpop.f32.mrf.mxu0 }
0x1046   :  { %v1108_v25 = vsel %vm68_vm1, %v2418_v23, -inf }
0x1047   :  { %1109 = vmax.xlane.f32.xlu0 %v1108_v25 }
0x10cc   :  { %v2422_v9 = vpop.xlane.xlu1 %1106 }
0x10cd   :  { %vm1127_vm9 = vcmp.eq.f32.partialorder %v2413_v18, %v2422_v9 }
0x10ce   :  { %v1129_v26 = vsel %vm1127_vm9, %v2183_v43, 16 }
0x10cf   :  { %v1131_v27 = vsel %vm68_vm1, %v1129_v26, 2147483647 }
0x10d0   :  { %v2428_v28 = vpop.xlane.xlu0 %1109  ;;  %v1133_v29 = vshra.s32 %v1131_v27, 16  ;;  %v1132_v38 = vand.u32 65535, %v1131_v27 }
0x10d1   :  { %vm1128_vm11 = vcmp.eq.f32.partialorder %v2418_v23, %v2428_v28 }
0x10d2   :  { %v1130_v30 = vsel %vm1128_vm11, %v2183_v43, 16  ;;  %v1135_v31 = vcvt.s32.f32 %v1133_v29  ;;  %v1134_v41 = vcvt.s32.f32 %v1132_v38 }
0x10d3   :  { %v1146_v32 = vsel %vm68_vm1, %v1130_v30, 2147483647 }
0x10d4   :  { %1136 = vmin.xlane.f32.xlu0 %v1135_v31  ;;  %v1148_v34 = vshra.s32 %v1146_v32, 16  ;;  %v1147_v45 = vand.u32 65535, %v1146_v32 }
0x10d6   :  { %v1150_v36 = vcvt.s32.f32 %v1148_v34  ;;  %v1149_v51 = vcvt.s32.f32 %v1147_v45  ;;  %v2024_v34 = vld [vmem:[%s2813_s5 + $0x10] sm:$0xff]  }
0x10d8   :  { %1151 = vmin.xlane.f32.xlu1 %v1150_v36 }
0x115d   :  { %v1137_v40 = vpop.xlane.xlu0 %1136 }
0x115e   :  { %vm1138_vm12 = vcmp.eq.f32.partialorder %v1135_v31, %v1137_v40  ;;  %v1143_v58 = vcvt.f32.s32 %v1137_v40 }
0x115f   :  { %v1139_v48 = vsel %vm1138_vm12, %v1134_v41, inf }
0x1160   :  { %1140 = vmin.xlane.f32.xlu0 %v1139_v48  ;;  %v1144_v62 = vshll.u32 %v1143_v58, 16 }
0x1161   :  { %v1152_v50 = vpop.xlane.xlu1 %1151 }
0x1162   :  { %vm1153_vm13 = vcmp.eq.f32.partialorder %v1150_v36, %v1152_v50  ;;  %v1158_v63 = vcvt.f32.s32 %v1152_v50  ;;  %v2026_v36 = vld [vmem:[%s2813_s5] sm:$0xff]  }
0x1163   :  { %v1154_v54 = vsel %vm1153_vm13, %v1149_v51, inf }
0x1164   :  { %1155 = vmin.xlane.f32.xlu1 %v1154_v54  ;;  %v1159_v10 = vshll.u32 %v1158_v63, 16 }
0x1175   :  { %1207 = vrot.lane.b32.xlu1 %v1707_v55, %s2031_s2 }
0x1176   :  { %1205 = vrot.lane.b32.xlu0 %v1706_v56, %s2031_s2 }
0x11e9   :  { %v1141_v59 = vpop.xlane.xlu0 %1140 }
0x11ea   :  { %v1142_v1 = vcvt.f32.s32 %v1141_v59 }
0x11ec   :  { %v1145_v6 = vadd.s32 %v1144_v62, %v1142_v1 }
0x11ed   :  { %v1156_v7 = vpop.xlane.xlu1 %1155  ;;  %v1206_v16 = vpop.permute.xlu0 %1205 }
0x11ee   :  { %1162 = vst.msk [vmem:[%s2818_s8] sm:$0xff] %vm1161_vm6, %v1145_v6  ;;  %vm1184_vm8 = vcmp.eq.s32.totalorder %v2183_v43, %v1145_v6  ;;  %v1157_v11 = vcvt.f32.s32 %v1156_v7 }
0x11ef   :  { %v1668_v13 = vsel %vm1184_vm8, 1.0, %v2028_v0  ;;  %vm1367_vm8 = vcmask 48168  }
0x11f0   :  { %v1704_v14 = vpack.c.bf16 %v1668_v13, %v1668_v13  ;;  %v1160_v15 = vadd.s32 %v1159_v10, %v1157_v11 }
0x11f1   :  { %v1208_v4 = vpop.permute.xlu1 %1207 }
0x11f2   :  { %1198 = vst.msk [vmem:[#allocation2] sm:$0xf] %vm116_vm2, %v1704_v14  ;;  %vm1185_vm9 = vcmp.eq.s32.totalorder %v2183_v43, %v1160_v15 }
0x11f3   :  { %1163 = vst.msk [vmem:[%s2818_s8 + $0x8] sm:$0xff] %vm1161_vm6, %v1160_v15  ;;  %v1669_v17 = vsel %vm1185_vm9, 1.0, %v2028_v0 }
0x11f4   :  { %1211 = vst.msk [vmem:[#allocation2] sm:$0xf] %vm130_vm3, %v1206_v16  ;;  %v1705_v19 = vpack.c.bf16 %v1669_v17, %v1669_v17 }
0x11f6   :  { %1199 = vst.msk [vmem:[#allocation2 + $0x4] sm:$0xf] %vm116_vm2, %v1705_v19 }
0x11f7   :  { %1212 = vst.msk [vmem:[#allocation2 + $0x4] sm:$0xf] %vm130_vm3, %v1208_v4 }
0x11fe   :  { %v1910_v20 = vld [vmem:[#allocation2] sm:$0xff]  }
0x11ff   :  { %1866 = vmatmul.mubr.msk.bf16.vlgmr.msra.gmra.mxu0 %vm164_vm4, %v1910_v20 }
0x1200   :  { %1888 = vmatpush3.bf16.msra.mxu0 %v2141_v21  ;;  %1891 = vmatprep.mubr.msk.bf16.mxu0 %vm2029_vm0, %v2028_v0 }
0x1201   :  { %1889 = vmatprep.subr.bf16.mxu0 %v2028_v0 }
0x1204   :  { %1890 = vmatpush3.bf16.msra.mxu0 %v2147_v22  ;;  %v2025_v22 = vld [vmem:[%s2813_s5 + $0x8] sm:$0xff]  }
0x12bf   :  { %v1257_v5 = vpop.f32.mrf.mxu0 }
0x12c0   :  { %v1258_v25 = vadd.f32 %v2225_v24, %v1257_v5 }
0x12c1   :  { %v1867_v26 = vpop.f32.mrf.mxu0 }
0x12c2   :  { %1932 = vtanh.f32 %v1258_v25 }
0x12c3   :  { %v1260_v27 = vpop.f32.mrf.mxu0 }
0x12c4   :  { %v1261_v29 = vadd.f32 %v2225_v24, %v1260_v27 }
0x12c5   :  { %v1868_v30 = vpop.f32.mrf.mxu0 }
0x12c6   :  { %1934 = vtanh.f32 %v1261_v29 }
0x12cf   :  { %v1933_v31 = vpop.eup %1932 }
0x12d0   :  { %v1710_v20 = vpack.c.bf16 %v1933_v31, %v1933_v31 }
0x12d3   :  { %v1935_v32 = vpop.eup %1934 }
0x12d4   :  { %v1266_v21 = vpack.c.bf16 %v1935_v32, %v1933_v31  ;;  %v1711_v4 = vpack.c.bf16 %v1935_v32, %v1935_v32 }
0x12d6   :  { %1874 = vmatmul.mubr.msk.bf16.vlgmr.msra.gmra.mxu1 %vm230_vm5, %v1266_v21 }
0x12d7   :  { %1878 = vmatpush3.bf16.msra.mxu1 %v2024_v34  ;;  %1883 = vmatprep.mubr.msk.bf16.mxu1 %vm2029_vm0, %v2028_v0 }
0x12d8   :  { %1879 = vmatprep.subr.bf16.mxu1 %v2028_v0 }
0x12db   :  { %1880 = vmatpush3.bf16.msra.mxu1 %v2025_v22 }
0x12dc   :  { %1881 = vmatprep.subr.bf16.mxu1 %v2028_v0 }
0x12df   :  { %1882 = vmatpush3.bf16.msra.mxu1 %v2026_v36 }
0x1396   :  { %v1304_v38 = vpop.f32.mrf.mxu1 }
0x1397   :  { %v2475_v40 = vadd.f32 %v2171_v33, %v1304_v38 }
0x1398   :  { %v1875_v41 = vpop.f32.mrf.mxu1 }
0x1399   :  { %v1311_v45 = vsel %vm68_vm1, %v2475_v40, -inf }
0x139a   :  { %1312 = vmax.xlane.f32.xlu1 %v1311_v45  ;;  %v1307_v48 = vpop.f32.mrf.mxu1 }
0x139b   :  { %v2480_v50 = vadd.f32 %v2171_v33, %v1307_v48 }
0x139c   :  { %v1876_v51 = vpop.f32.mrf.mxu1 }
0x139d   :  { %v1314_v54 = vsel %vm68_vm1, %v2480_v50, -inf }
0x139e   :  { %1315 = vmax.xlane.f32.xlu0 %v1314_v54 }
0x1423   :  { %v2484_v55 = vpop.xlane.xlu1 %1312 }
0x1424   :  { %vm1333_vm0 = vcmp.eq.f32.partialorder %v2475_v40, %v2484_v55 }
0x1425   :  { %v1335_v56 = vsel %vm1333_vm0, %v2183_v43, 16 }
0x1426   :  { %v1337_v58 = vsel %vm68_vm1, %v1335_v56, 2147483647 }
0x1427   :  { %v2490_v59 = vpop.xlane.xlu0 %1315  ;;  %v1339_v62 = vshra.s32 %v1337_v58, 16  ;;  %v1338_v10 = vand.u32 65535, %v1337_v58 }
0x1428   :  { %vm1334_vm11 = vcmp.eq.f32.partialorder %v2480_v50, %v2490_v59 }
0x1429   :  { %v1336_v33 = vsel %vm1334_vm11, %v2183_v43, 16  ;;  %v1341_v63 = vcvt.s32.f32 %v1339_v62  ;;  %v1340_v13 = vcvt.s32.f32 %v1338_v10 }
0x142a   :  { %v1352_v1 = vsel %vm68_vm1, %v1336_v33, 2147483647 }
0x142b   :  { %1342 = vmin.xlane.f32.xlu0 %v1341_v63  ;;  %v1354_v6 = vshra.s32 %v1352_v1, 16  ;;  %v1353_v14 = vand.u32 65535, %v1352_v1 }
0x142d   :  { %v1356_v7 = vcvt.s32.f32 %v1354_v6  ;;  %v1355_v17 = vcvt.s32.f32 %v1353_v14 }
0x142f   :  { %1357 = vmin.xlane.f32.xlu1 %v1356_v7 }
0x14b4   :  { %v1343_v11 = vpop.xlane.xlu0 %1342 }
0x14b5   :  { %vm1344_vm12 = vcmp.eq.f32.partialorder %v1341_v63, %v1343_v11  ;;  %v1349_v5 = vcvt.f32.s32 %v1343_v11  ;;  %v2027_v11 = vld [vmem:[%s2817_s7] ss:$0 sm:$0xff] }
0x14b6   :  { %v1345_v15 = vsel %vm1344_vm12, %v1340_v13, inf }
0x14b7   :  { %1346 = vmin.xlane.f32.xlu0 %v1345_v15  ;;  %v1350_v26 = vshll.u32 %v1349_v5, 16 }
0x14b8   :  { %v1358_v16 = vpop.xlane.xlu1 %1357 }
0x14b9   :  { %vm1359_vm13 = vcmp.eq.f32.partialorder %v1356_v7, %v1358_v16  ;;  %v1364_v27 = vcvt.f32.s32 %v1358_v16 }
0x14ba   :  { %v1360_v19 = vsel %vm1359_vm13, %v1355_v17, inf }
0x14bb   :  { %1361 = vmin.xlane.f32.xlu1 %v1360_v19  ;;  %v1365_v34 = vshll.u32 %v1364_v27, 16 }
0x14cc   :  { %1413 = vrot.lane.b32.xlu1 %v1711_v4, %s2031_s2  ;;  %v2525_v4 = vsub.f32 %v2174_v35, %v2185_v44  ;;  %v2543_v35 = vsub.f32 %v2297_v46, %v2307_v57  ;;  %v2548_v44 = vsub.f32 %v2302_v53, %v2313_v60  ;;  %v2560_v53 = vsub.f32 %v2360_v2, %v2370_v12 }
0x14cd   :  { %1411 = vrot.lane.b32.xlu0 %v1710_v20, %s2031_s2  ;;  %v2529_v20 = vsub.f32 %v2179_v39, %v2191_v47  ;;  %v2552_v47 = vsub.f32 %v2355_v61, %v2364_v8  ;;  %v2565_v61 = vsub.f32 %v2413_v18, %v2422_v9  ;;  %v2574_v12 = vsub.f32 %v2418_v23, %v2428_v28 }
0x14ce   :  { %v283_v5 = vmul.f32 1.442695, %v2525_v4  ;;  %v909_v2 = vmul.f32 1.442695, %v2560_v53 }
0x14cf   :  { %v285_v27 = vmul.f32 1.442695, %v2529_v20 }
0x1540   :  { %v1347_v25 = vpop.xlane.xlu0 %1346 }
0x1541   :  { %v1348_v29 = vcvt.f32.s32 %v1347_v25  ;;  %v2534_v25 = vsub.f32 %v2239_v37, %v2249_v49  ;;  %v703_v49 = vmul.f32 1.442695, %v2548_v44 }
0x1543   :  { %v1351_v30 = vadd.s32 %v1350_v26, %v1348_v29  ;;  %v2538_v26 = vsub.f32 %v2244_v42, %v2255_v52  ;;  %v495_v39 = vmul.f32 1.442695, %v2534_v25  ;;  %v701_v42 = vmul.f32 1.442695, %v2543_v35 }
0x1544   :  { %v1362_v21 = vpop.xlane.xlu1 %1361  ;;  %v1412_v38 = vpop.permute.xlu0 %1411  ;;  %v907_v52 = vmul.f32 1.442695, %v2552_v47 }
0x1545   :  { %1368 = vst.msk [vmem:[%s2818_s8] sm:$0xff] %vm1367_vm8, %v1351_v30  ;;  %vm1390_vm9 = vcmp.eq.s32.totalorder %v2183_v43, %v1351_v30  ;;  %v1363_v31 = vcvt.f32.s32 %v1362_v21  ;;  %v497_v37 = vmul.f32 1.442695, %v2538_v26 }
0x1546   :  { %v1677_v32 = vsel %vm1390_vm9, 1.0, %v2028_v0 }
0x1547   :  { %v1708_v22 = vpack.c.bf16 %v1677_v32, %v1677_v32  ;;  %v1366_v36 = vadd.s32 %v1365_v34, %v1363_v31  ;;  %v1113_v31 = vmul.f32 1.442695, %v2565_v61  ;;  %v2582_v32 = vsub.f32 %v2475_v40, %v2484_v55 }
0x1548   :  { %v1414_v48 = vpop.permute.xlu1 %1413  ;;  %v2595_v55 = vsub.f32 %v2480_v50, %v2490_v59 }
0x1549   :  { %1404 = vst.msk [vmem:[#allocation2] sm:$0xf] %vm116_vm2, %v1708_v22  ;;  %vm1391_vm0 = vcmp.eq.s32.totalorder %v2183_v43, %v1366_v36  ;;  %v1319_v40 = vmul.f32 1.442695, %v2582_v32 }
0x154a   :  { %1369 = vst.msk [vmem:[%s2818_s8 + $0x8] sm:$0xff] %vm1367_vm8, %v1366_v36  ;;  %v1678_v41 = vsel %vm1391_vm0, 1.0, %v2028_v0 }
0x154b   :  { %1417 = vst.msk [vmem:[#allocation2] sm:$0xf] %vm130_vm3, %v1412_v38  ;;  %v1709_v45 = vpack.c.bf16 %v1678_v41, %v1678_v41 }
0x154d   :  { %1405 = vst.msk [vmem:[#allocation2 + $0x4] sm:$0xf] %vm116_vm2, %v1709_v45 }
0x154e   :  { %1418 = vst.msk [vmem:[#allocation2 + $0x4] sm:$0xf] %vm130_vm3, %v1414_v48 }
0x1555   :  { %v1911_v51 = vld [vmem:[#allocation2] sm:$0xff]  }
0x1556   :  { %1884 = vmatmul.mubr.msk.bf16.vlgmr.msra.gmra.mxu1 %vm164_vm4, %v1911_v51 }
0x1616   :  { %v1463_v54 = vpop.f32.mrf.mxu1 }
0x1617   :  { %v1464_v56 = vadd.f32 %v2225_v24, %v1463_v54 }
0x1618   :  { %v1885_v58 = vpop.f32.mrf.mxu1 }
0x1619   :  { %1936 = vtanh.f32 %v1464_v56  ;;  %v1321_v56 = vmul.f32 1.442695, %v2595_v55 }
0x161a   :  { %v1466_v62 = vpop.f32.mrf.mxu1 }
0x161b   :  { %v1467_v33 = vadd.f32 %v2225_v24, %v1466_v62 }
0x161c   :  { %v1886_v63 = vpop.f32.mrf.mxu1 }
0x161d   :  { %1938 = vtanh.f32 %v1467_v33 }
0x161e   :  { %1940 = vpow2.f32 %v283_v5 }
0x161f   :  { %1942 = vpow2.f32 %v285_v27 }
0x1620   :  { %1944 = vpow2.f32 %v495_v39 }
0x1621   :  { %1946 = vpow2.f32 %v497_v37 }
0x1622   :  { %1948 = vpow2.f32 %v701_v42 }
0x1623   :  { %1950 = vpow2.f32 %v703_v49 }
0x1624   :  { %1952 = vpow2.f32 %v907_v52 }
0x1626   :  { %v1937_v1 = vpop.eup %1936 }
0x162a   :  { %v1939_v6 = vpop.eup %1938 }
0x162b   :  { %v1472_v7 = vpack.c.bf16 %v1939_v6, %v1937_v1  ;;  %v1941_v38 = vpop.eup %1940 }
0x162c   :  { %v1943_v41 = vpop.eup %1942  ;;  %v287_v45 = vsel %vm68_vm1, %v1941_v38, 0.0  ;;  %v338_v39 = vmul.f32 %v1941_v38, %v2525_v4 }
0x162d   :  { %1892 = vmatmul.mubr.msk.bf16.vlgmr.msra.gmra.mxu0 %vm230_vm5, %v1472_v7  ;;  %v1945_v48 = vpop.eup %1944  ;;  %v290_v62 = vsel %vm68_vm1, %v1943_v41, 0.0 }
0x162e   :  { %v1947_v51 = vpop.eup %1946  ;;  %v499_v58 = vsel %vm68_vm1, %v1945_v48, 0.0  ;;  %v340_v42 = vsel %vm68_vm1, %v338_v39, 0.0  ;;  %v550_v52 = vmul.f32 %v1945_v48, %v2534_v25 }
0x162f   :  { %v1949_v54 = vpop.eup %1948  ;;  %v502_v1 = vsel %vm68_vm1, %v1947_v51, 0.0  ;;  %v551_v4 = vmul.f32 %v1947_v51, %v2538_v26 }
0x1630   :  { %v1951_v33 = vpop.eup %1950  ;;  %v705_v63 = vsel %vm68_vm1, %v1949_v54, 0.0 }
0x1631   :  { %v1953_v50 = vpop.eup %1952 }
0x1632   :  { %v962_v25 = vmul.f32 %v1953_v50, %v2552_v47 }
0x16ed   :  { %v1510_v10 = vpop.f32.mrf.mxu0 }
0x16ee   :  { %v1511_v13 = vadd.f32 %v2027_v11, %v1510_v10 }
0x16ef   :  { %v1893_v14 = vpop.f32.mrf.mxu0 }
0x16f0   :  { %v1517_v15 = vsel %vm68_vm1, %v1511_v13, -inf }
0x16f1   :  { %1518 = vmax.xlane.f32.xlu1 %v1517_v15  ;;  %v1513_v16 = vpop.f32.mrf.mxu0 }
0x16f2   :  { %v1514_v24 = vadd.f32 %v2027_v11, %v1513_v16  ;;  %v911_v11 = vsel %vm68_vm1, %v1953_v50, 0.0 }
0x16f3   :  { %v1894_v17 = vpop.f32.mrf.mxu0 }
0x16f4   :  { %v1520_v19 = vsel %vm68_vm1, %v1514_v24, -inf }
0x16f5   :  { %1521 = vmax.xlane.f32.xlu0 %v1520_v19 }
0x177a   :  { %v1519_v46 = vpop.xlane.xlu1 %1518 }
0x177b   :  { %v1523_v57 = vsub.f32 %v1511_v13, %v1519_v46  ;;  %vm1539_vm2 = vcmp.eq.f32.partialorder %v1511_v13, %v1519_v46  ;;  %v708_v13 = vsel %vm68_vm1, %v1951_v33, 0.0  ;;  %v339_v46 = vmul.f32 %v1943_v41, %v2529_v20 }
0x177c   :  { %v1541_v60 = vsel %vm1539_vm2, %v2183_v43, 16  ;;  %v757_v20 = vmul.f32 %v1951_v33, %v2548_v44 }
0x177d   :  { %v1525_v8 = vmul.f32 1.442695, %v1523_v57  ;;  %v2568_v29 = vsel %vm68_vm1, %v1541_v60, 2147483647  ;;  %v343_v60 = vsel %vm68_vm1, %v339_v46, 0.0 }
0x177e   :  { %v1522_v30 = vpop.xlane.xlu0 %1521  ;;  %v1545_v21 = vshra.s32 %v2568_v29, 16  ;;  %v1544_v41 = vand.u32 65535, %v2568_v29 }
0x177f   :  { %1954 = vpow2.f32 %v1525_v8  ;;  %v1524_v34 = vsub.f32 %v1514_v24, %v1522_v30  ;;  %vm1540_vm3 = vcmp.eq.f32.partialorder %v1514_v24, %v1522_v30  ;;  %v756_v8 = vmul.f32 %v1949_v54, %v2543_v35 }
0x1780   :  { %v1542_v18 = vsel %vm1540_vm3, %v2183_v43, 16  ;;  %v2577_v9 = vcvt.s32.f32 %v1545_v21  ;;  %v1115_v43 = vmul.f32 1.442695, %v2574_v12  ;;  %v555_v21 = vsel %vm68_vm1, %v551_v4, 0.0 }
0x1781   :  { %v1527_v22 = vmul.f32 1.442695, %v1524_v34  ;;  %v2585_v36 = vsel %vm68_vm1, %v1542_v18, 2147483647  ;;  %v758_v30 = vsel %vm68_vm1, %v756_v8, 0.0 }
0x1782   :  { %1548 = vmin.xlane.f32.xlu0 %v2577_v9  ;;  %v1560_v23 = vshra.s32 %v2585_v36, 16 }
0x1783   :  { %1956 = vpow2.f32 %v1527_v22 }
0x1784   :  { %1958 = vpow2.f32 %v909_v2  ;;  %v2590_v28 = vcvt.s32.f32 %v1560_v23  ;;  %v761_v2 = vsel %vm68_vm1, %v757_v20, 0.0 }
0x1785   :  { %1960 = vpow2.f32 %v1113_v31 }
0x1786   :  { %288 = vadd.xlane.f32.xlu0 %v287_v45  ;;  %1563 = vmin.xlane.f32.xlu1 %v2590_v28  ;;  %1962 = vpow2.f32 %v1115_v43 }
0x1787   :  { %1964 = vpow2.f32 %v1319_v40 }
0x1788   :  { %1966 = vpow2.f32 %v1321_v56 }
0x178a   :  { %500 = vadd.xlane.f32.xlu0 %v499_v58  ;;  %291 = vadd.xlane.f32.xlu1 %v290_v62 }
0x178c   :  { %v1955_v59 = vpop.eup %1954 }
0x178d   :  { %v2604_v6 = vmul.f32 %v1955_v59, %v1523_v57  ;;  %v552_v57 = vsel %vm68_vm1, %v550_v52, 0.0  ;;  %v1529_v26 = vsel %vm68_vm1, %v1955_v59, 0.0 }
0x178e   :  { %706 = vadd.xlane.f32.xlu0 %v705_v63  ;;  %503 = vadd.xlane.f32.xlu1 %v502_v1 }
0x178f   :  { %v1582_v29 = vsel %vm68_vm1, %v2604_v6, 0.0 }
0x1790   :  { %v1957_v7 = vpop.eup %1956 }
0x1791   :  { %v1959_v10 = vpop.eup %1958  ;;  %v2608_v14 = vmul.f32 %v1957_v7, %v1524_v34  ;;  %v964_v34 = vsel %vm68_vm1, %v962_v25, 0.0  ;;  %v1532_v47 = vsel %vm68_vm1, %v1957_v7, 0.0 }
0x1792   :  { %v1961_v15 = vpop.eup %1960  ;;  %912 = vadd.xlane.f32.xlu0 %v911_v11  ;;  %709 = vadd.xlane.f32.xlu1 %v708_v13  ;;  %v914_v17 = vsel %vm68_vm1, %v1959_v10, 0.0  ;;  %v963_v35 = vmul.f32 %v1959_v10, %v2560_v53 }
0x1793   :  { %v1963_v16 = vpop.eup %1962  ;;  %v1117_v24 = vsel %vm68_vm1, %v1961_v15, 0.0  ;;  %v1168_v31 = vmul.f32 %v1961_v15, %v2565_v61 }
0x1794   :  { %v1965_v19 = vpop.eup %1964  ;;  %v1120_v27 = vsel %vm68_vm1, %v1963_v16, 0.0  ;;  %v967_v18 = vsel %vm68_vm1, %v963_v35, 0.0  ;;  %v1169_v38 = vmul.f32 %v1963_v16, %v2574_v12  ;;  %v1559_v12 = vand.u32 65535, %v2585_v36 }
0x1795   :  { %v1323_v5 = vsel %vm68_vm1, %v1965_v19, 0.0  ;;  %v1967_v37 = vpop.eup %1966  ;;  %v1170_v44 = vsel %vm68_vm1, %v1168_v31, 0.0  ;;  %v1374_v22 = vmul.f32 %v1965_v19, %v2582_v32  ;;  %v1546_v32 = vcvt.s32.f32 %v1544_v41 }
0x1796   :  { %1118 = vadd.xlane.f32.xlu0 %v1117_v24  ;;  %915 = vadd.xlane.f32.xlu1 %v914_v17  ;;  %v1326_v49 = vsel %vm68_vm1, %v1967_v37, 0.0  ;;  %v1173_v23 = vsel %vm68_vm1, %v1169_v38, 0.0  ;;  %v1375_v43 = vmul.f32 %v1967_v37, %v2595_v55  ;;  %v1561_v51 = vcvt.s32.f32 %v1559_v12 }
0x1797   :  { %v1376_v53 = vsel %vm68_vm1, %v1374_v22, 0.0 }
0x1798   :  { %v1379_v61 = vsel %vm68_vm1, %v1375_v43, 0.0 }
0x179a   :  { %1324 = vadd.xlane.f32.xlu0 %v1323_v5  ;;  %1121 = vadd.xlane.f32.xlu1 %v1120_v27 }
0x179e   :  { %341 = vadd.xlane.f32.xlu0 %v340_v42  ;;  %1327 = vadd.xlane.f32.xlu1 %v1326_v49 }
0x17a2   :  { %553 = vadd.xlane.f32.xlu0 %v552_v57  ;;  %344 = vadd.xlane.f32.xlu1 %v343_v60 }
0x17a6   :  { %759 = vadd.xlane.f32.xlu0 %v758_v30  ;;  %556 = vadd.xlane.f32.xlu1 %v555_v21 }
0x17aa   :  { %965 = vadd.xlane.f32.xlu0 %v964_v34  ;;  %762 = vadd.xlane.f32.xlu1 %v761_v2 }
0x17ae   :  { %1530 = vadd.xlane.f32.xlu0 %v1529_v26  ;;  %968 = vadd.xlane.f32.xlu1 %v967_v18 }
0x17b2   :  { %1171 = vadd.xlane.f32.xlu0 %v1170_v44  ;;  %1533 = vadd.xlane.f32.xlu1 %v1532_v47 }
0x17b6   :  { %1377 = vadd.xlane.f32.xlu0 %v1376_v53  ;;  %1174 = vadd.xlane.f32.xlu1 %v1173_v23 }
0x17ba   :  { %1380 = vadd.xlane.f32.xlu1 %v1379_v61 }
0x180b   :  { %v2642_v40 = vpop.xlane.xlu0 %1548 }
0x180c   :  { %vm1550_vm4 = vcmp.eq.f32.partialorder %v2577_v9, %v2642_v40  ;;  %v1585_v9 = vsel %vm68_vm1, %v2608_v14, 0.0  ;;  %vm1573_vm1 = vcmask 56368  }
0x180d   :  { %v1551_v45 = vsel %vm1550_vm4, %v1546_v32, inf }
0x180e   :  { %1552 = vmin.xlane.f32.xlu0 %v1551_v45 }
0x180f   :  { %v2647_v48 = vpop.xlane.xlu1 %1563  ;;  %v289_v55 = vpop.xlane.xlu0 %288 }
0x1810   :  { %1968 = vlog2.f32 %v289_v55  ;;  %vm1565_vm5 = vcmp.eq.f32.partialorder %v2590_v28, %v2647_v48 }
0x1811   :  { %v1566_v54 = vsel %vm1565_vm5, %v1561_v51, inf }
0x1812   :  { %1567 = vmin.xlane.f32.xlu1 %v1566_v54  ;;  %1583 = vadd.xlane.f32.xlu0 %v1582_v29 }
0x1813   :  { %v292_v36 = vpop.xlane.xlu1 %291  ;;  %v501_v56 = vpop.xlane.xlu0 %500 }
0x1814   :  { %1970 = vlog2.f32 %v292_v36 }
0x1815   :  { %1972 = vlog2.f32 %v501_v56 }
0x1816   :  { %1586 = vadd.xlane.f32.xlu1 %v1585_v9 }
0x1817   :  { %v504_v58 = vpop.xlane.xlu1 %503  ;;  %v707_v62 = vpop.xlane.xlu0 %706 }
0x1818   :  { %1974 = vlog2.f32 %v504_v58 }
0x1819   :  { %1976 = vrcp.f32 %v289_v55 }
0x181a   :  { %1978 = vlog2.f32 %v707_v62 }
0x181b   :  { %1980 = vrcp.f32 %v292_v36  ;;  %v710_v28 = vpop.xlane.xlu1 %709  ;;  %v913_v33 = vpop.xlane.xlu0 %912 }
0x181c   :  { %1982 = vlog2.f32 %v710_v28 }
0x181d   :  { %v1969_v50 = vpop.eup %1968  ;;  %1984 = vrcp.f32 %v501_v56 }
0x181e   :  { %1986 = vlog2.f32 %v913_v33  ;;  %v294_v59 = vmul.f32 0.6931472, %v1969_v50 }
0x181f   :  { %1988 = vrcp.f32 %v504_v58  ;;  %v916_v63 = vpop.xlane.xlu1 %915  ;;  %v1119_v1 = vpop.xlane.xlu0 %1118 }
0x1820   :  { %1990 = vlog2.f32 %v916_v63  ;;  %v334_v6 = vsub.f32 0.0, %v294_v59 }
0x1821   :  { %v1971_v7 = vpop.eup %1970  ;;  %1992 = vrcp.f32 %v707_v62 }
0x1822   :  { %1994 = vlog2.f32 %v1119_v1  ;;  %336 = vst.msk [vmem:[%s2820_s9] sm:$0xff] %vm331_vm10, %v334_v6  ;;  %v296_v10 = vmul.f32 0.6931472, %v1971_v7  ;;  %v1973_v11 = vpop.eup %1972 }
0x1823   :  { %1996 = vrcp.f32 %v710_v28  ;;  %v1122_v13 = vpop.xlane.xlu1 %1121  ;;  %v1325_v14 = vpop.xlane.xlu0 %1324  ;;  %v506_v16 = vmul.f32 0.6931472, %v1973_v11 }
0x1824   :  { %1998 = vlog2.f32 %v1122_v13  ;;  %v335_v15 = vsub.f32 0.0, %v296_v10 }
0x1825   :  { %v1975_v24 = vpop.eup %1974  ;;  %2000 = vrcp.f32 %v913_v33  ;;  %v546_v19 = vsub.f32 0.0, %v506_v16 }
0x1826   :  { %v1977_v17 = vpop.eup %1976  ;;  %2002 = vlog2.f32 %v1325_v14  ;;  %337 = vst.msk [vmem:[%s2820_s9 + $0x8] sm:$0xff] %vm331_vm10, %v335_v15  ;;  %v508_v5 = vmul.f32 0.6931472, %v1975_v24 }
0x1827   :  { %v1979_v27 = vpop.eup %1978  ;;  %v2663_v39 = vpop.xlane.xlu1 %1327  ;;  %548 = vst.msk [vmem:[%s2820_s9] sm:$0xff] %vm543_vm7, %v546_v19 }
0x1828   :  { %v342_v37 = vpop.xlane.xlu0 %341  ;;  %v1981_v42 = vpop.eup %1980  ;;  %2004 = vlog2.f32 %v2663_v39  ;;  %v547_v52 = vsub.f32 0.0, %v508_v5  ;;  %v712_v46 = vmul.f32 0.6931472, %v1979_v27 }
0x1829   :  { %v347_v49 = vmul.f32 %v1977_v17, %v342_v37  ;;  %v1983_v57 = vpop.eup %1982  ;;  %2006 = vrcp.f32 %v916_v63 }
0x182a   :  { %v1985_v60 = vpop.eup %1984  ;;  %549 = vst.msk [vmem:[%s2820_s9 + $0x8] sm:$0xff] %vm543_vm7, %v547_v52  ;;  %v752_v4 = vsub.f32 0.0, %v712_v46  ;;  %v714_v30 = vmul.f32 0.6931472, %v1983_v57  ;;  %2008 = vrcp.f32 %v1119_v1 }
0x182b   :  { %v350_v8 = vsub.f32 %v294_v59, %v347_v49  ;;  %v1987_v21 = vpop.eup %1986  ;;  %v345_v25 = vpop.xlane.xlu1 %344  ;;  %2010 = vrcp.f32 %v1122_v13 }
0x182c   :  { %v554_v20 = vpop.xlane.xlu0 %553  ;;  %v1989_v34 = vpop.eup %1988  ;;  %v349_v2 = vmul.f32 %v1981_v42, %v345_v25  ;;  %754 = vst.msk [vmem:[%s2820_s9] sm:$0xff] %vm749_vm15, %v752_v4  ;;  %v753_v26 = vsub.f32 0.0, %v714_v30  ;;  %v918_v18 = vmul.f32 0.6931472, %v1987_v21  ;;  %2012 = vrcp.f32 %v1325_v14 }
0x182d   :  { %352 = vst.msk [vmem:[%s2821_s10] sm:$0xff] %vm331_vm10, %v350_v8  ;;  %v559_v35 = vmul.f32 %v1985_v60, %v554_v20  ;;  %v1991_v31 = vpop.eup %1990  ;;  %2014 = vrcp.f32 %v2663_v39 }
0x182e   :  { %v1993_v44 = vpop.eup %1992  ;;  %v351_v47 = vsub.f32 %v296_v10, %v349_v2  ;;  %755 = vst.msk [vmem:[%s2820_s9 + $0x8] sm:$0xff] %vm749_vm15, %v753_v26  ;;  %v958_v38 = vsub.f32 0.0, %v918_v18  ;;  %v920_v53 = vmul.f32 0.6931472, %v1991_v31 }
0x182f   :  { %v562_v22 = vsub.f32 %v506_v16, %v559_v35  ;;  %v1995_v23 = vpop.eup %1994  ;;  %v557_v43 = vpop.xlane.xlu1 %556 }
0x1830   :  { %v760_v61 = vpop.xlane.xlu0 %759  ;;  %v1997_v41 = vpop.eup %1996  ;;  %353 = vst.msk [vmem:[%s2821_s10 + $0x8] sm:$0xff] %vm331_vm10, %v351_v47  ;;  %v561_v32 = vmul.f32 %v1989_v34, %v557_v43  ;;  %v959_v45 = vsub.f32 0.0, %v920_v53  ;;  %v1124_v55 = vmul.f32 0.6931472, %v1995_v23  ;;  %vm1596_vm10 = vcmask 64568  }
0x1831   :  { %564 = vst.msk [vmem:[%s2821_s10] sm:$0xff] %vm543_vm7, %v562_v22  ;;  %v765_v12 = vmul.f32 %v1993_v44, %v760_v61  ;;  %v1999_v51 = vpop.eup %1998  ;;  %v1555_v44 = vcvt.f32.s32 %v2642_v40 }
0x1832   :  { %960 = vst.msk [vmem:[%s2820_s9] sm:$0xff] %vm955_vm14, %v958_v38  ;;  %v2001_v54 = vpop.eup %2000  ;;  %v563_v29 = vsub.f32 %v508_v5, %v561_v32  ;;  %961 = vst.msk [vmem:[%s2820_s9 + $0x8] sm:$0xff] %vm955_vm14, %v959_v45  ;;  %v1164_v56 = vsub.f32 0.0, %v1124_v55  ;;  %v1126_v9 = vmul.f32 0.6931472, %v1999_v51  ;;  %v1570_v38 = vcvt.f32.s32 %v2647_v48 }
0x1833   :  { %v768_v36 = vsub.f32 %v712_v46, %v765_v12  ;;  %v2003_v58 = vpop.eup %2002  ;;  %v763_v62 = vpop.xlane.xlu1 %762  ;;  %v1556_v22 = vshll.u32 %v1555_v44, 16 }
0x1834   :  { %v966_v28 = vpop.xlane.xlu0 %965  ;;  %565 = vst.msk [vmem:[%s2821_s10 + $0x8] sm:$0xff] %vm543_vm7, %v563_v29  ;;  %v767_v33 = vmul.f32 %v1997_v41, %v763_v62  ;;  %v1165_v59 = vsub.f32 0.0, %v1126_v9  ;;  %v1330_v63 = vmul.f32 0.6931472, %v2003_v58  ;;  %v1571_v32 = vshll.u32 %v1570_v38, 16 }
0x1835   :  { %770 = vst.msk [vmem:[%s2821_s10] sm:$0xff] %vm749_vm15, %v768_v36  ;;  %v971_v50 = vmul.f32 %v2001_v54, %v966_v28  ;;  %v2005_v1 = vpop.eup %2004 }
0x1836   :  { %1166 = vst.msk [vmem:[%s2820_s9] sm:$0xff] %vm1161_vm6, %v1164_v56  ;;  %v769_v6 = vsub.f32 %v714_v30, %v767_v33  ;;  %1167 = vst.msk [vmem:[%s2820_s9 + $0x8] sm:$0xff] %vm1161_vm6, %v1165_v59  ;;  %v1370_v10 = vsub.f32 0.0, %v1330_v63  ;;  %v1332_v11 = vmul.f32 0.6931472, %v2005_v1  ;;  %v2007_v13 = vpop.eup %2006 }
0x1837   :  { %v974_v7 = vsub.f32 %v918_v18, %v971_v50  ;;  %v969_v14 = vpop.xlane.xlu1 %968  ;;  %v2009_v17 = vpop.eup %2008 }
0x1838   :  { %v1531_v15 = vpop.xlane.xlu0 %1530  ;;  %771 = vst.msk [vmem:[%s2821_s10 + $0x8] sm:$0xff] %vm749_vm15, %v769_v6  ;;  %v973_v16 = vmul.f32 %v2007_v13, %v969_v14  ;;  %v1371_v24 = vsub.f32 0.0, %v1332_v11  ;;  %v2011_v39 = vpop.eup %2010 }
0x1839   :  { %976 = vst.msk [vmem:[%s2821_s10] sm:$0xff] %vm955_vm14, %v974_v7  ;;  %2016 = vlog2.f32 %v1531_v15  ;;  %v2013_v42 = vpop.eup %2012 }
0x183a   :  { %1372 = vst.msk [vmem:[%s2820_s9] sm:$0xff] %vm1367_vm8, %v1370_v10  ;;  %v975_v19 = vsub.f32 %v920_v53, %v973_v16  ;;  %1373 = vst.msk [vmem:[%s2820_s9 + $0x8] sm:$0xff] %vm1367_vm8, %v1371_v24  ;;  %v2015_v8 = vpop.eup %2014 }
0x183b   :  { %v1534_v5 = vpop.xlane.xlu1 %1533 }
0x183c   :  { %v1172_v27 = vpop.xlane.xlu0 %1171  ;;  %977 = vst.msk [vmem:[%s2821_s10 + $0x8] sm:$0xff] %vm955_vm14, %v975_v19  ;;  %2018 = vlog2.f32 %v1534_v5 }
0x183d   :  { %v1177_v37 = vmul.f32 %v2009_v17, %v1172_v27  ;;  %2020 = vrcp.f32 %v1531_v15 }
0x183e   :  { %2022 = vrcp.f32 %v1534_v5 }
0x183f   :  { %v1180_v49 = vsub.f32 %v1124_v55, %v1177_v37  ;;  %v1175_v52 = vpop.xlane.xlu1 %1174 }
0x1840   :  { %v1378_v46 = vpop.xlane.xlu0 %1377  ;;  %v1179_v57 = vmul.f32 %v2011_v39, %v1175_v52 }
0x1841   :  { %1182 = vst.msk [vmem:[%s2821_s10] sm:$0xff] %vm1161_vm6, %v1180_v49  ;;  %v1383_v60 = vmul.f32 %v2013_v42, %v1378_v46 }
0x1842   :  { %v1181_v4 = vsub.f32 %v1126_v9, %v1179_v57 }
0x1843   :  { %v1386_v30 = vsub.f32 %v1330_v63, %v1383_v60  ;;  %v1381_v21 = vpop.xlane.xlu1 %1380 }
0x1844   :  { %1183 = vst.msk [vmem:[%s2821_s10 + $0x8] sm:$0xff] %vm1161_vm6, %v1181_v4  ;;  %v1385_v25 = vmul.f32 %v2015_v8, %v1381_v21 }
0x1845   :  { %1388 = vst.msk [vmem:[%s2821_s10] sm:$0xff] %vm1367_vm8, %v1386_v30 }
0x1846   :  { %v2017_v20 = vpop.eup %2016  ;;  %v1387_v34 = vsub.f32 %v1332_v11, %v1385_v25 }
0x1847   :  { %v1536_v2 = vmul.f32 0.6931472, %v2017_v20 }
0x1848   :  { %1389 = vst.msk [vmem:[%s2821_s10 + $0x8] sm:$0xff] %vm1367_vm8, %v1387_v34 }
0x1849   :  { %v1576_v35 = vsub.f32 0.0, %v1536_v2  ;;  %v2019_v26 = vpop.eup %2018 }
0x184a   :  { %v1538_v18 = vmul.f32 0.6931472, %v2019_v26  ;;  %v2021_v43 = vpop.eup %2020 }
0x184b   :  { %1578 = vst.msk [vmem:[%s2820_s9] sm:$0xff] %vm1573_vm1, %v1576_v35  ;;  %v2023_v55 = vpop.eup %2022 }
0x184c   :  { %1599 = vst.msk [vmem:[%s2820_s9] sm:$0xff] %vm1596_vm10, %v2028_v0  ;;  %v1577_v31 = vsub.f32 0.0, %v1538_v18 }
0x184e   :  { %1579 = vst.msk [vmem:[%s2820_s9 + $0x8] sm:$0xff] %vm1573_vm1, %v1577_v31 }
0x184f   :  { %1600 = vst.msk [vmem:[%s2820_s9 + $0x8] sm:$0xff] %vm1596_vm10, %v2028_v0 }
0x1897   :  { %v1553_v47 = vpop.xlane.xlu0 %1552 }
0x1898   :  { %v1554_v53 = vcvt.f32.s32 %v1553_v47 }
0x189a   :  { %v1557_v23 = vadd.s32 %v1556_v22, %v1554_v53 }
0x189b   :  { %v1568_v61 = vpop.xlane.xlu1 %1567  ;;  %v1584_v41 = vpop.xlane.xlu0 %1583 }
0x189c   :  { %1574 = vst.msk [vmem:[%s2818_s8] sm:$0xff] %vm1573_vm1, %v1557_v23  ;;  %v1569_v12 = vcvt.f32.s32 %v1568_v61  ;;  %v1589_v45 = vmul.f32 %v2021_v43, %v1584_v41 }
0x189d   :  { %1597 = vst.msk [vmem:[%s2818_s8] sm:$0xff] %vm1596_vm10, %v2030_v3 }
0x189e   :  { %v1572_v40 = vadd.s32 %v1571_v32, %v1569_v12  ;;  %v1592_v48 = vsub.f32 %v1536_v2, %v1589_v45 }
0x189f   :  { %v1587_v51 = vpop.xlane.xlu1 %1586 }
0x18a0   :  { %1575 = vst.msk [vmem:[%s2818_s8 + $0x8] sm:$0xff] %vm1573_vm1, %v1572_v40  ;;  %1594 = vst.msk [vmem:[%s2821_s10] sm:$0xff] %vm1573_vm1, %v1592_v48  ;;  %v1591_v54 = vmul.f32 %v2023_v55, %v1587_v51 }
0x18a1   :  { %1598 = vst.msk [vmem:[%s2818_s8 + $0x8] sm:$0xff] %vm1596_vm10, %v2030_v3  ;;  %1601 = vst.msk [vmem:[%s2821_s10] sm:$0xff] %vm1596_vm10, %v2028_v0 }
0x18a2   :  { %v1593_v29 = vsub.f32 %v1538_v18, %v1591_v54 }
0x18a4   :  { %1595 = vst.msk [vmem:[%s2821_s10 + $0x8] sm:$0xff] %vm1573_vm1, %v1593_v29 }
0x18a5   :  { %1602 = vst.msk [vmem:[%s2821_s10 + $0x8] sm:$0xff] %vm1596_vm10, %v2028_v0 }

</bundles_post_ra>
